<compile_context>
chip_gen: v6e
topology: v6e:2x2x1
jax: 0.10.0
libtpu: 0.0.40
codegen_flags: <defaults>
</compile_context>

<pallas_src>
import jax
import jax.numpy as jnp
from jax.experimental import pallas as pl
from jax.experimental.pallas import tpu as pltpu

FILTERS = [32, 32]                  # config['gnn_filters']
N_FEAT = 16                         # n_feat
REDUCTION = 2                       # config['reduction']
NUM_FILTER = len(FILTERS)
F_MAX = max(max(FILTERS), N_FEAT)   # padded feature / filter width (32)
CHANNEL_DIM = sum(FILTERS)          # 64
HIDDEN = CHANNEL_DIM // REDUCTION   # 32
GIN_EPS = 1.0                       # GINConv(nn, eps=True): bool True -> eps == 1.0
BN_EPS = 1e-5

# Packed weight-cube row indices (wmat slab, shape (N_WMAT, F_MAX, F_MAX)):
#   4*i+0..3 : level-i GIN Linear1, GIN Linear2 (BN folded), deepsets inner, outer
IDX_CW1 = 4 * NUM_FILTER            # conv_stack L1 weight, split per level (+i)
IDX_CW2 = IDX_CW1 + NUM_FILTER      # conv_stack L2 weight
IDX_SW1 = IDX_CW2 + 1               # score_layer L1 weight (16 cols zero-padded)
N_WMAT = IDX_SW1 + 1                # 12
# Packed bias-slab row indices (bvec slab, shape (N_BVEC, 128)):
IDX_CB1 = 4 * NUM_FILTER
IDX_CB2 = IDX_CB1 + 1
IDX_SB1 = IDX_CB2 + 1
IDX_SB2 = IDX_SB1 + 1               # score_layer L2 bias, replicated over 128 lanes
N_BVEC = IDX_SB2 + 1                # 12


def cgd_kernel(x_ref, p_ref, s_ref, wmat_ref, bvec_ref, finw_ref, out_ref):
    """Fused CGD forward for one group of stacked graph pairs."""
    b = s_ref.shape[0] // 2                      # pairs per group (static)
    feat = x_ref[...]                            # (2N, F_MAX) f32 carried activation
    acc = jnp.zeros((b, HIDDEN), jnp.float32)

    for i in range(NUM_FILTER):                  # static unroll (2 levels)
        # Lazy static slices of the VMEM-resident weight slabs (bounds live ranges).
        w1 = wmat_ref[4 * i + 0]                 # GIN nn Linear1 (in-padded), bf16
        w2 = wmat_ref[4 * i + 1]                 # GIN nn Linear2, BN scale+shift folded
        wi = wmat_ref[4 * i + 2]                 # deepsets inner MLP
        wo = wmat_ref[4 * i + 3]                 # deepsets outer MLP
        b1 = bvec_ref[4 * i + 0:4 * i + 1, :F_MAX]
        b2 = bvec_ref[4 * i + 1:4 * i + 2, :F_MAX]
        bi = bvec_ref[4 * i + 2:4 * i + 3, :F_MAX]
        bo = bvec_ref[4 * i + 3:4 * i + 4, :F_MAX]

        # GINConv: nn((1+eps)*x + sum_j x_j) == nn(P @ x). bf16 MXU operands, f32 acc.
        agg = jnp.dot(p_ref[...], feat.astype(jnp.bfloat16),
                      preferred_element_type=jnp.float32)
        h = jnp.maximum(jnp.dot(agg.astype(jnp.bfloat16), w1,
                                preferred_element_type=jnp.float32) + b1, 0.0)
        h = jnp.dot(h.astype(jnp.bfloat16), w2,
                    preferred_element_type=jnp.float32) + b2      # Linear2 + BN folded
        feat = jnp.maximum(h, 0.0)               # F.relu (+ dropout = identity, eval)

        # deepsets inner -> global_add_pool (via stacked S) -> deepsets outer
        inner = jnp.maximum(jnp.dot(feat.astype(jnp.bfloat16), wi,
                                    preferred_element_type=jnp.float32) + bi, 0.0)
        pool = jnp.dot(s_ref[...], inner.astype(jnp.bfloat16),
                       preferred_element_type=jnp.float32)        # (2B, F)
        outer = jnp.maximum(jnp.dot(pool.astype(jnp.bfloat16), wo,
                                    preferred_element_type=jnp.float32) + bo, 0.0)

        # fuse_type == 'cat': exp(-(o1-o2)^2); conv_stack L1 weight is split per
        # level so the per-level contribution is accumulated instead of lane-concat.
        d = outer[:b, :] - outer[b:, :]
        diff = jnp.exp(-(d * d))                                  # (B, F) f32
        acc = acc + jnp.dot(diff.astype(jnp.bfloat16), wmat_ref[IDX_CW1 + i],
                            preferred_element_type=jnp.float32)

    # conv_stack: Linear -> ReLU -> Dropout -> Linear -> Dropout -> Tanh
    h = jnp.maximum(acc + bvec_ref[IDX_CB1:IDX_CB1 + 1, :F_MAX], 0.0)
    score_rep = jnp.tanh(jnp.dot(h.astype(jnp.bfloat16), wmat_ref[IDX_CW2],
                                 preferred_element_type=jnp.float32)
                         + bvec_ref[IDX_CB2:IDX_CB2 + 1, :F_MAX])
    # score_layer: Linear -> ReLU -> Linear ; then sigmoid.
    # NOTE: lane-dense trick relies on sw1/sb1 being ZERO-padded in cols 16..31 and
    # the padded rows 16..31 of finw being zero (relu(0)=0 keeps them inert).
    sh = jnp.maximum(jnp.dot(score_rep.astype(jnp.bfloat16), wmat_ref[IDX_SW1],
                             preferred_element_type=jnp.float32)
                     + bvec_ref[IDX_SB1:IDX_SB1 + 1, :F_MAX], 0.0)
    logit = (jnp.dot(sh.astype(jnp.bfloat16), finw_ref[...],
                     preferred_element_type=jnp.float32)
             + bvec_ref[IDX_SB2:IDX_SB2 + 1, :])
    out_ref[...] = jax.nn.sigmoid(logit)         # (B, 128), B multiple of 8 -> unmasked


def cgd_forward(x_all, p_all, s_all, wmat, bvec, fin_w,
                *, num_groups, pairs_per_group, nodes2):
    """Grid over pair-groups; weights stay VMEM-resident (constant index_map)."""
    b = pairs_per_group
    out = pl.pallas_call(
        cgd_kernel,
        out_shape=jax.ShapeDtypeStruct((num_groups * b, 128), jnp.float32),
        grid=(num_groups,),
        in_specs=[
            pl.BlockSpec((nodes2, F_MAX), lambda g: (g, 0)),           # features (f32)
            pl.BlockSpec((nodes2, nodes2), lambda g: (g, 0)),          # block-diag P (bf16)
            pl.BlockSpec((2 * b, nodes2), lambda g: (g, 0)),           # pooling S (bf16)
            pl.BlockSpec((N_WMAT, F_MAX, F_MAX), lambda g: (0, 0, 0)),  # weights, resident
            pl.BlockSpec((N_BVEC, 128), lambda g: (0, 0)),              # biases, resident
            pl.BlockSpec((HIDDEN, 128), lambda g: (0, 0)),              # score W2, resident
        ],
        out_specs=pl.BlockSpec((b, 128), lambda g: (g, 0)),
        compiler_params=pltpu.CompilerParams(dimension_semantics=("parallel",)),
    )(x_all, p_all, s_all, wmat, bvec, fin_w)
    return out[:, 0]                              # torch .view(-1); lane 0 holds the score
    # TODO(synk): if DMA is still exposed at larger group counts, add
    # pipeline_mode=pl.Buffered(3) on the x/p/s specs.


# ----------------------------- parameters ------------------------------------

def init_raw_params(key):
    """Deterministic synthetic weights matching the module's shapes (f32, unpacked)."""
    in_dims = [N_FEAT] + FILTERS[:-1]
    levels = []
    for i, f in enumerate(FILTERS):
        d_in = in_dims[i]
        key, k1, k2, k3, k4, k5, k6, k7, k8, k9, k10 = jax.random.split(key, 11)
        gw1 = jax.random.normal(k1, (d_in, f), jnp.float32) * 0.1     # gin nn Linear1
        gb1 = jax.random.normal(k2, (f,), jnp.float32) * 0.1
        gw2 = jax.random.normal(k3, (f, f), jnp.float32) * 0.1        # gin nn Linear2
        gb2 = jax.random.normal(k4, (f,), jnp.float32) * 0.1
        bn_mean = jax.random.normal(k5, (f,), jnp.float32) * 0.05     # BN running stats
        bn_var = jax.random.uniform(k6, (f,), jnp.float32, 0.5, 1.5)
        bn_gamma = 1.0 + jax.random.normal(k7, (f,), jnp.float32) * 0.1
        bn_beta = jax.random.normal(k8, (f,), jnp.float32) * 0.05
        iw = jax.random.normal(k9, (f, f), jnp.float32) * 0.1         # mlp_list_inner
        ib = jnp.zeros((f,), jnp.float32)
        ow = jax.random.normal(k10, (f, f), jnp.float32) * 0.1        # mlp_list_outer
        ob = jnp.zeros((f,), jnp.float32)
        levels.append((gw1, gb1, gw2, gb2, (bn_mean, bn_var, bn_gamma, bn_beta),
                       iw, ib, ow, ob))
    key, k1, k2, k3, k4, k5, k6, k7, k8 = jax.random.split(key, 9)
    cw1 = jax.random.normal(k1, (CHANNEL_DIM, HIDDEN), jnp.float32) * 0.1   # conv_stack L1
    cb1 = jax.random.normal(k2, (HIDDEN,), jnp.float32) * 0.05
    cw2 = jax.random.normal(k3, (HIDDEN, HIDDEN), jnp.float32) * 0.1        # conv_stack L2
    cb2 = jax.random.normal(k4, (HIDDEN,), jnp.float32) * 0.05
    sw1 = jax.random.normal(k5, (HIDDEN, 16), jnp.float32) * 0.1            # score_layer L1
    sb1 = jax.random.normal(k6, (16,), jnp.float32) * 0.05
    sw2 = jax.random.normal(k7, (16, 1), jnp.float32) * 0.1                 # score_layer L2
    sb2 = jax.random.normal(k8, (1,), jnp.float32) * 0.05
    return {'levels': levels, 'head': (cw1, cb1, cw2, cb2, sw1, sb1, sw2, sb2)}


def pack_params(raw):
    """Pack all parameters into 3 slabs: weight cube (bf16), bias slab (f32), fin W (bf16)."""
    def pad_w(w):
        return jnp.pad(w, ((0, F_MAX - w.shape[0]), (0, F_MAX - w.shape[1])))

    def pad_row(v):
        return jnp.pad(v, (0, 128 - v.shape[0]))

    wmats, brows = [], []
    for (gw1, gb1, gw2, gb2, bn, iw, ib, ow, ob) in raw['levels']:
        mean, var, gamma, beta = bn
        inv = gamma / jnp.sqrt(var + BN_EPS)              # fold BN scale AND shift
        gw2f = gw2 * inv[None, :]
        gb2f = (gb2 - mean) * inv + beta
        wmats += [pad_w(gw1), pad_w(gw2f), pad_w(iw), pad_w(ow)]
        brows += [pad_row(gb1), pad_row(gb2f), pad_row(ib), pad_row(ob)]

    cw1, cb1, cw2, cb2, sw1, sb1, sw2, sb2 = raw['head']
    off = 0
    for f in FILTERS:                                     # split conv_stack L1 per level
        wmats.append(pad_w(cw1[off:off + f, :]))
        off += f
    wmats.append(pad_w(cw2))
    wmats.append(pad_w(sw1))                              # (32,16) -> (32,32) zero cols
    brows += [pad_row(cb1), pad_row(cb2), pad_row(sb1),
              jnp.full((128,), sb2[0], jnp.float32)]      # lane-replicated final bias

    wmat = jnp.stack(wmats).astype(jnp.bfloat16)          # (N_WMAT, F_MAX, F_MAX)
    bvec = jnp.stack(brows).astype(jnp.float32)           # (N_BVEC, 128)
    sw2_pad = jnp.pad(sw2, ((0, HIDDEN - sw2.shape[0]), (0, 0)))   # zero rows 16..31
    fin_w = jnp.tile(sw2_pad, (1, 128)).astype(jnp.bfloat16)       # (HIDDEN, 128)
    return wmat, bvec, fin_w


# ----------------------------- graph construction ----------------------------

def ring_graph_prop(num_graphs, nodes_per_graph):
    """P = (1+eps)*I + A with GIN eps folded host-side; symmetric ring per graph."""
    n = num_graphs * nodes_per_graph
    idx = jnp.arange(n)
    g = idx // nodes_per_graph
    nxt = g * nodes_per_graph + (idx % nodes_per_graph + 1) % nodes_per_graph
    a = jnp.zeros((n, n), jnp.float32)
    a = a.at[idx, nxt].set(1.0)
    a = a.at[nxt, idx].set(1.0)
    return a + (1.0 + GIN_EPS) * jnp.eye(n, dtype=jnp.float32)


def pooling_matrix(num_graphs, nodes_per_graph):
    batch = jnp.repeat(jnp.arange(num_graphs), nodes_per_graph)
    return jax.nn.one_hot(batch, num_graphs, dtype=jnp.float32).T   # (B, N)


def block_diag2(a, b):
    ra, ca = a.shape
    rb, cb = b.shape
    top = jnp.concatenate([a, jnp.zeros((ra, cb), a.dtype)], axis=1)
    bot = jnp.concatenate([jnp.zeros((rb, ca), b.dtype), b], axis=1)
    return jnp.concatenate([top, bot], axis=0)


def build_group(key, pairs, nodes_per_graph):
    """One pair-group: side-1 graphs stacked first, then side-2 graphs."""
    n_side = pairs * nodes_per_graph
    k1, k2 = jax.random.split(key)
    x1 = jax.random.normal(k1, (n_side, N_FEAT), jnp.float32)
    x2 = jax.random.normal(k2, (n_side, N_FEAT), jnp.float32)
    p_side = ring_graph_prop(pairs, nodes_per_graph)
    s_side = pooling_matrix(pairs, nodes_per_graph)
    x = jnp.concatenate([x1, x2], axis=0)           # (2*n_side, N_FEAT)
    p = block_diag2(p_side, p_side)                 # (2*n_side, 2*n_side)
    s = block_diag2(s_side, s_side)                 # (2*pairs, 2*n_side)
    return x, p, s


# ----------------------------- pure-JAX f32 reference ------------------------

def cgd_reference(x, p, s, raw):
    """f32 reference of the PyTorch forward on one stacked pair-group."""
    feat = x
    b = s.shape[0] // 2
    diff_rep = []
    for (gw1, gb1, gw2, gb2, bn, iw, ib, ow, ob) in raw['levels']:
        mean, var, gamma, beta = bn
        agg = p @ feat
        h = jnp.maximum(agg @ gw1 + gb1, 0.0)
        h = h @ gw2 + gb2
        h = (h - mean) / jnp.sqrt(var + BN_EPS) * gamma + beta     # BatchNorm1d (eval)
        feat = jnp.maximum(h, 0.0)
        inner = jnp.maximum(feat @ iw + ib, 0.0)
        pool = s @ inner
        outer = jnp.maximum(pool @ ow + ob, 0.0)
        d = outer[:b] - outer[b:]
        diff_rep.append(jnp.exp(-(d * d)))
    diff_rep = jnp.concatenate(diff_rep, axis=1)
    cw1, cb1, cw2, cb2, sw1, sb1, sw2, sb2 = raw['head']
    h = jnp.maximum(diff_rep @ cw1 + cb1, 0.0)
    score_rep = jnp.tanh(h @ cw2 + cb2)
    sh = jnp.maximum(score_rep @ sw1 + sb1, 0.0)
    return jax.nn.sigmoid(sh @ sw2 + sb2).reshape(-1)


if __name__ == "__main__":
    NUM_GROUPS = 2            # grid axis ("parallel" -> shards across v7x TensorCores)
    PAIRS_PER_GROUP = 16      # graph pairs scored per grid step
    NODES_PER_GRAPH = 8
    NODES2 = 2 * PAIRS_PER_GROUP * NODES_PER_GRAPH     # 256 stacked nodes per group

    key = jax.random.PRNGKey(0)
    key, kparam = jax.random.split(key)
    raw = init_raw_params(kparam)
    wmat, bvec, fin_w = pack_params(raw)

    xg, pg, sg = [], [], []
    for _ in range(NUM_GROUPS):
        key, kgrp = jax.random.split(key)
        x, p, s = build_group(kgrp, PAIRS_PER_GROUP, NODES_PER_GRAPH)
        xg.append(x); pg.append(p); sg.append(s)

    x_all = jnp.pad(jnp.concatenate(xg, axis=0), ((0, 0), (0, F_MAX - N_FEAT)))  # f32
    p_all = jnp.concatenate(pg, axis=0).astype(jnp.bfloat16)   # exact small ints
    s_all = jnp.concatenate(sg, axis=0).astype(jnp.bfloat16)   # exact 0/1

    # TODO(synk): use_sim/NTN, x_augment core-MLP path, 'stack'/'diff' fuse types and
    # the use_gs branch are not exercised under this config and are not implemented.
    # TODO(synk): for non-toy graphs the dense P (O(N^2) bytes) should become a
    # scalar-prefetched sparse aggregation, and on v7x (64 MiB VMEM) the node axis of
    # P must be tiled (reduction axis last in the grid) or vmem_limit_bytes raised.
    score = cgd_forward(x_all, p_all, s_all, wmat, bvec, fin_w,
                        num_groups=NUM_GROUPS, pairs_per_group=PAIRS_PER_GROUP,
                        nodes2=NODES2)
    jax.block_until_ready(score)

    ref = jnp.concatenate([cgd_reference(xg[g], pg[g], sg[g], raw)
                           for g in range(NUM_GROUPS)])
    assert score.shape == (NUM_GROUPS * PAIRS_PER_GROUP,)
    assert bool(jnp.all(jnp.isfinite(score)))
    assert bool(jnp.all((score > 0.0) & (score < 1.0)))
    assert float(jnp.max(jnp.abs(score - ref))) < 3e-2   # bf16 MXU vs f32 reference
    print("KERNEL_OK")
</pallas_src>

<mosaic_0001>
module attributes {stable_mosaic.version = 11 : i64} {
  func.func @cgd_kernel(%arg0: i32, %arg1: memref<256x32xf32, #tpu.memory_space<vmem>>, %arg2: memref<256x256xbf16, #tpu.memory_space<vmem>>, %arg3: memref<32x256xbf16, #tpu.memory_space<vmem>>, %arg4: memref<12x32x32xbf16, #tpu.memory_space<vmem>>, %arg5: memref<12x128xf32, #tpu.memory_space<vmem>>, %arg6: memref<32x128xbf16, #tpu.memory_space<vmem>>, %arg7: memref<16x128xf32, #tpu.memory_space<vmem>>) attributes {dimension_semantics = [#tpu.dimension_semantics<parallel>], iteration_bounds = array<i64: 2>, scalar_prefetch = 0 : i64, scratch_operands = 0 : i64, tpu.core_type = #tpu.core_type<tc>, window_params = [{transform_indices = @transform_0, window_bounds = array<i64: 256, 32>}, {transform_indices = @transform_1, window_bounds = array<i64: 256, 256>}, {transform_indices = @transform_2, window_bounds = array<i64: 32, 256>}, {pipeline_mode = #tpu.pipeline_mode<synchronous>, transform_indices = @transform_3, window_bounds = array<i64: 12, 32, 32>}, {pipeline_mode = #tpu.pipeline_mode<synchronous>, transform_indices = @transform_4, window_bounds = array<i64: 12, 128>}, {pipeline_mode = #tpu.pipeline_mode<synchronous>, transform_indices = @transform_5, window_bounds = array<i64: 32, 128>}, {transform_indices = @transform_6, window_bounds = array<i64: 16, 128>}]} {
    %c0 = arith.constant 0 : index
    %c0_0 = arith.constant 0 : index
    %0 = vector.load %arg1[%c0, %c0_0] : memref<256x32xf32, #tpu.memory_space<vmem>>, vector<256x32xf32>
    %cst = arith.constant 0.000000e+00 : f32
    %1 = vector.broadcast %cst : f32 to vector<16x32xf32>
    %c0_1 = arith.constant 0 : index
    %c0_2 = arith.constant 0 : index
    %c0_3 = arith.constant 0 : index
    %2 = vector.load %arg4[%c0_1, %c0_2, %c0_3] : memref<12x32x32xbf16, #tpu.memory_space<vmem>>, vector<1x32x32xbf16>
    %3 = vector.shape_cast %2 : vector<1x32x32xbf16> to vector<32x32xbf16>
    %c1 = arith.constant 1 : index
    %c0_4 = arith.constant 0 : index
    %c0_5 = arith.constant 0 : index
    %4 = vector.load %arg4[%c1, %c0_4, %c0_5] : memref<12x32x32xbf16, #tpu.memory_space<vmem>>, vector<1x32x32xbf16>
    %5 = vector.shape_cast %4 : vector<1x32x32xbf16> to vector<32x32xbf16>
    %c2 = arith.constant 2 : index
    %c0_6 = arith.constant 0 : index
    %c0_7 = arith.constant 0 : index
    %6 = vector.load %arg4[%c2, %c0_6, %c0_7] : memref<12x32x32xbf16, #tpu.memory_space<vmem>>, vector<1x32x32xbf16>
    %7 = vector.shape_cast %6 : vector<1x32x32xbf16> to vector<32x32xbf16>
    %c3 = arith.constant 3 : index
    %c0_8 = arith.constant 0 : index
    %c0_9 = arith.constant 0 : index
    %8 = vector.load %arg4[%c3, %c0_8, %c0_9] : memref<12x32x32xbf16, #tpu.memory_space<vmem>>, vector<1x32x32xbf16>
    %9 = vector.shape_cast %8 : vector<1x32x32xbf16> to vector<32x32xbf16>
    %c0_10 = arith.constant 0 : index
    %c0_11 = arith.constant 0 : index
    %10 = vector.load %arg5[%c0_10, %c0_11] : memref<12x128xf32, #tpu.memory_space<vmem>>, vector<1x32xf32>
    %c1_12 = arith.constant 1 : index
    %c0_13 = arith.constant 0 : index
    %11 = vector.load %arg5[%c1_12, %c0_13] : memref<12x128xf32, #tpu.memory_space<vmem>>, vector<1x32xf32>
    %c2_14 = arith.constant 2 : index
    %c0_15 = arith.constant 0 : index
    %12 = vector.load %arg5[%c2_14, %c0_15] : memref<12x128xf32, #tpu.memory_space<vmem>>, vector<1x32xf32>
    %c3_16 = arith.constant 3 : index
    %c0_17 = arith.constant 0 : index
    %13 = vector.load %arg5[%c3_16, %c0_17] : memref<12x128xf32, #tpu.memory_space<vmem>>, vector<1x32xf32>
    %c0_18 = arith.constant 0 : index
    %c0_19 = arith.constant 0 : index
    %14 = vector.load %arg2[%c0_18, %c0_19] : memref<256x256xbf16, #tpu.memory_space<vmem>>, vector<256x256xbf16>
    %15 = arith.truncf %0 : vector<256x32xf32> to vector<256x32xbf16>
    %cst_20 = arith.constant dense<0.000000e+00> : vector<256x32xf32>
    %16 = tpu.matmul %14, %15, %cst_20 {dimension_numbers = #tpu.dot_dimension_numbers<[1], [0], [0], [1], [0, 0, 1, 1], [], []>} : vector<256x256xbf16>, vector<256x32xbf16>, vector<256x32xf32> -> vector<256x32xf32>
    %17 = arith.truncf %16 : vector<256x32xf32> to vector<256x32xbf16>
    %cst_21 = arith.constant dense<0.000000e+00> : vector<256x32xf32>
    %18 = tpu.matmul %17, %3, %cst_21 {dimension_numbers = #tpu.dot_dimension_numbers<[1], [0], [0], [1], [0, 0, 1, 1], [], []>} : vector<256x32xbf16>, vector<32x32xbf16>, vector<256x32xf32> -> vector<256x32xf32>
    %19 = vector.broadcast %10 : vector<1x32xf32> to vector<256x32xf32>
    %20 = arith.addf %18, %19 : vector<256x32xf32>
    %cst_22 = arith.constant 0.000000e+00 : f32
    %21 = vector.broadcast %cst_22 : f32 to vector<256x32xf32>
    %22 = arith.maximumf %20, %21 : vector<256x32xf32>
    %23 = arith.truncf %22 : vector<256x32xf32> to vector<256x32xbf16>
    %cst_23 = arith.constant dense<0.000000e+00> : vector<256x32xf32>
    %24 = tpu.matmul %23, %5, %cst_23 {dimension_numbers = #tpu.dot_dimension_numbers<[1], [0], [0], [1], [0, 0, 1, 1], [], []>} : vector<256x32xbf16>, vector<32x32xbf16>, vector<256x32xf32> -> vector<256x32xf32>
    %25 = vector.broadcast %11 : vector<1x32xf32> to vector<256x32xf32>
    %26 = arith.addf %24, %25 : vector<256x32xf32>
    %cst_24 = arith.constant 0.000000e+00 : f32
    %27 = vector.broadcast %cst_24 : f32 to vector<256x32xf32>
    %28 = arith.maximumf %26, %27 : vector<256x32xf32>
    %29 = arith.truncf %28 : vector<256x32xf32> to vector<256x32xbf16>
    %cst_25 = arith.constant dense<0.000000e+00> : vector<256x32xf32>
    %30 = tpu.matmul %29, %7, %cst_25 {dimension_numbers = #tpu.dot_dimension_numbers<[1], [0], [0], [1], [0, 0, 1, 1], [], []>} : vector<256x32xbf16>, vector<32x32xbf16>, vector<256x32xf32> -> vector<256x32xf32>
    %31 = vector.broadcast %12 : vector<1x32xf32> to vector<256x32xf32>
    %32 = arith.addf %30, %31 : vector<256x32xf32>
    %cst_26 = arith.constant 0.000000e+00 : f32
    %33 = vector.broadcast %cst_26 : f32 to vector<256x32xf32>
    %34 = arith.maximumf %32, %33 : vector<256x32xf32>
    %c0_27 = arith.constant 0 : index
    %c0_28 = arith.constant 0 : index
    %35 = vector.load %arg3[%c0_27, %c0_28] : memref<32x256xbf16, #tpu.memory_space<vmem>>, vector<32x256xbf16>
    %36 = arith.truncf %34 : vector<256x32xf32> to vector<256x32xbf16>
    %cst_29 = arith.constant dense<0.000000e+00> : vector<32x32xf32>
    %37 = tpu.matmul %35, %36, %cst_29 {dimension_numbers = #tpu.dot_dimension_numbers<[1], [0], [0], [1], [0, 0, 1, 1], [], []>} : vector<32x256xbf16>, vector<256x32xbf16>, vector<32x32xf32> -> vector<32x32xf32>
    %38 = arith.truncf %37 : vector<32x32xf32> to vector<32x32xbf16>
    %cst_30 = arith.constant dense<0.000000e+00> : vector<32x32xf32>
    %39 = tpu.matmul %38, %9, %cst_30 {dimension_numbers = #tpu.dot_dimension_numbers<[1], [0], [0], [1], [0, 0, 1, 1], [], []>} : vector<32x32xbf16>, vector<32x32xbf16>, vector<32x32xf32> -> vector<32x32xf32>
    %40 = vector.broadcast %13 : vector<1x32xf32> to vector<32x32xf32>
    %41 = arith.addf %39, %40 : vector<32x32xf32>
    %cst_31 = arith.constant 0.000000e+00 : f32
    %42 = vector.broadcast %cst_31 : f32 to vector<32x32xf32>
    %43 = arith.maximumf %41, %42 : vector<32x32xf32>
    %44 = vector.extract_strided_slice %43 {offsets = [0, 0], sizes = [16, 32], strides = [1, 1]} : vector<32x32xf32> to vector<16x32xf32>
    %45 = vector.extract_strided_slice %43 {offsets = [16, 0], sizes = [16, 32], strides = [1, 1]} : vector<32x32xf32> to vector<16x32xf32>
    %46 = arith.subf %44, %45 : vector<16x32xf32>
    %47 = arith.mulf %46, %46 : vector<16x32xf32>
    %cst_32 = arith.constant 0.000000e+00 : f32
    %48 = vector.broadcast %cst_32 : f32 to vector<16x32xf32>
    %49 = arith.subf %48, %47 : vector<16x32xf32>
    %50 = math.exp %49 : vector<16x32xf32>
    %51 = arith.truncf %50 : vector<16x32xf32> to vector<16x32xbf16>
    %c8 = arith.constant 8 : index
    %c0_33 = arith.constant 0 : index
    %c0_34 = arith.constant 0 : index
    %52 = vector.load %arg4[%c8, %c0_33, %c0_34] : memref<12x32x32xbf16, #tpu.memory_space<vmem>>, vector<1x32x32xbf16>
    %53 = vector.shape_cast %52 : vector<1x32x32xbf16> to vector<32x32xbf16>
    %cst_35 = arith.constant dense<0.000000e+00> : vector<16x32xf32>
    %54 = tpu.matmul %51, %53, %cst_35 {dimension_numbers = #tpu.dot_dimension_numbers<[1], [0], [0], [1], [0, 0, 1, 1], [], []>} : vector<16x32xbf16>, vector<32x32xbf16>, vector<16x32xf32> -> vector<16x32xf32>
    %55 = arith.addf %1, %54 : vector<16x32xf32>
    %c4 = arith.constant 4 : index
    %c0_36 = arith.constant 0 : index
    %c0_37 = arith.constant 0 : index
    %56 = vector.load %arg4[%c4, %c0_36, %c0_37] : memref<12x32x32xbf16, #tpu.memory_space<vmem>>, vector<1x32x32xbf16>
    %57 = vector.shape_cast %56 : vector<1x32x32xbf16> to vector<32x32xbf16>
    %c5 = arith.constant 5 : index
    %c0_38 = arith.constant 0 : index
    %c0_39 = arith.constant 0 : index
    %58 = vector.load %arg4[%c5, %c0_38, %c0_39] : memref<12x32x32xbf16, #tpu.memory_space<vmem>>, vector<1x32x32xbf16>
    %59 = vector.shape_cast %58 : vector<1x32x32xbf16> to vector<32x32xbf16>
    %c6 = arith.constant 6 : index
    %c0_40 = arith.constant 0 : index
    %c0_41 = arith.constant 0 : index
    %60 = vector.load %arg4[%c6, %c0_40, %c0_41] : memref<12x32x32xbf16, #tpu.memory_space<vmem>>, vector<1x32x32xbf16>
    %61 = vector.shape_cast %60 : vector<1x32x32xbf16> to vector<32x32xbf16>
    %c7 = arith.constant 7 : index
    %c0_42 = arith.constant 0 : index
    %c0_43 = arith.constant 0 : index
    %62 = vector.load %arg4[%c7, %c0_42, %c0_43] : memref<12x32x32xbf16, #tpu.memory_space<vmem>>, vector<1x32x32xbf16>
    %63 = vector.shape_cast %62 : vector<1x32x32xbf16> to vector<32x32xbf16>
    %c4_44 = arith.constant 4 : index
    %c0_45 = arith.constant 0 : index
    %64 = vector.load %arg5[%c4_44, %c0_45] : memref<12x128xf32, #tpu.memory_space<vmem>>, vector<1x32xf32>
    %c5_46 = arith.constant 5 : index
    %c0_47 = arith.constant 0 : index
    %65 = vector.load %arg5[%c5_46, %c0_47] : memref<12x128xf32, #tpu.memory_space<vmem>>, vector<1x32xf32>
    %c6_48 = arith.constant 6 : index
    %c0_49 = arith.constant 0 : index
    %66 = vector.load %arg5[%c6_48, %c0_49] : memref<12x128xf32, #tpu.memory_space<vmem>>, vector<1x32xf32>
    %c7_50 = arith.constant 7 : index
    %c0_51 = arith.constant 0 : index
    %67 = vector.load %arg5[%c7_50, %c0_51] : memref<12x128xf32, #tpu.memory_space<vmem>>, vector<1x32xf32>
    %c0_52 = arith.constant 0 : index
    %c0_53 = arith.constant 0 : index
    %68 = vector.load %arg2[%c0_52, %c0_53] : memref<256x256xbf16, #tpu.memory_space<vmem>>, vector<256x256xbf16>
    %69 = arith.truncf %28 : vector<256x32xf32> to vector<256x32xbf16>
    %cst_54 = arith.constant dense<0.000000e+00> : vector<256x32xf32>
    %70 = tpu.matmul %68, %69, %cst_54 {dimension_numbers = #tpu.dot_dimension_numbers<[1], [0], [0], [1], [0, 0, 1, 1], [], []>} : vector<256x256xbf16>, vector<256x32xbf16>, vector<256x32xf32> -> vector<256x32xf32>
    %71 = arith.truncf %70 : vector<256x32xf32> to vector<256x32xbf16>
    %cst_55 = arith.constant dense<0.000000e+00> : vector<256x32xf32>
    %72 = tpu.matmul %71, %57, %cst_55 {dimension_numbers = #tpu.dot_dimension_numbers<[1], [0], [0], [1], [0, 0, 1, 1], [], []>} : vector<256x32xbf16>, vector<32x32xbf16>, vector<256x32xf32> -> vector<256x32xf32>
    %73 = vector.broadcast %64 : vector<1x32xf32> to vector<256x32xf32>
    %74 = arith.addf %72, %73 : vector<256x32xf32>
    %cst_56 = arith.constant 0.000000e+00 : f32
    %75 = vector.broadcast %cst_56 : f32 to vector<256x32xf32>
    %76 = arith.maximumf %74, %75 : vector<256x32xf32>
    %77 = arith.truncf %76 : vector<256x32xf32> to vector<256x32xbf16>
    %cst_57 = arith.constant dense<0.000000e+00> : vector<256x32xf32>
    %78 = tpu.matmul %77, %59, %cst_57 {dimension_numbers = #tpu.dot_dimension_numbers<[1], [0], [0], [1], [0, 0, 1, 1], [], []>} : vector<256x32xbf16>, vector<32x32xbf16>, vector<256x32xf32> -> vector<256x32xf32>
    %79 = vector.broadcast %65 : vector<1x32xf32> to vector<256x32xf32>
    %80 = arith.addf %78, %79 : vector<256x32xf32>
    %cst_58 = arith.constant 0.000000e+00 : f32
    %81 = vector.broadcast %cst_58 : f32 to vector<256x32xf32>
    %82 = arith.maximumf %80, %81 : vector<256x32xf32>
    %83 = arith.truncf %82 : vector<256x32xf32> to vector<256x32xbf16>
    %cst_59 = arith.constant dense<0.000000e+00> : vector<256x32xf32>
    %84 = tpu.matmul %83, %61, %cst_59 {dimension_numbers = #tpu.dot_dimension_numbers<[1], [0], [0], [1], [0, 0, 1, 1], [], []>} : vector<256x32xbf16>, vector<32x32xbf16>, vector<256x32xf32> -> vector<256x32xf32>
    %85 = vector.broadcast %66 : vector<1x32xf32> to vector<256x32xf32>
    %86 = arith.addf %84, %85 : vector<256x32xf32>
    %cst_60 = arith.constant 0.000000e+00 : f32
    %87 = vector.broadcast %cst_60 : f32 to vector<256x32xf32>
    %88 = arith.maximumf %86, %87 : vector<256x32xf32>
    %c0_61 = arith.constant 0 : index
    %c0_62 = arith.constant 0 : index
    %89 = vector.load %arg3[%c0_61, %c0_62] : memref<32x256xbf16, #tpu.memory_space<vmem>>, vector<32x256xbf16>
    %90 = arith.truncf %88 : vector<256x32xf32> to vector<256x32xbf16>
    %cst_63 = arith.constant dense<0.000000e+00> : vector<32x32xf32>
    %91 = tpu.matmul %89, %90, %cst_63 {dimension_numbers = #tpu.dot_dimension_numbers<[1], [0], [0], [1], [0, 0, 1, 1], [], []>} : vector<32x256xbf16>, vector<256x32xbf16>, vector<32x32xf32> -> vector<32x32xf32>
    %92 = arith.truncf %91 : vector<32x32xf32> to vector<32x32xbf16>
    %cst_64 = arith.constant dense<0.000000e+00> : vector<32x32xf32>
    %93 = tpu.matmul %92, %63, %cst_64 {dimension_numbers = #tpu.dot_dimension_numbers<[1], [0], [0], [1], [0, 0, 1, 1], [], []>} : vector<32x32xbf16>, vector<32x32xbf16>, vector<32x32xf32> -> vector<32x32xf32>
    %94 = vector.broadcast %67 : vector<1x32xf32> to vector<32x32xf32>
    %95 = arith.addf %93, %94 : vector<32x32xf32>
    %cst_65 = arith.constant 0.000000e+00 : f32
    %96 = vector.broadcast %cst_65 : f32 to vector<32x32xf32>
    %97 = arith.maximumf %95, %96 : vector<32x32xf32>
    %98 = vector.extract_strided_slice %97 {offsets = [0, 0], sizes = [16, 32], strides = [1, 1]} : vector<32x32xf32> to vector<16x32xf32>
    %99 = vector.extract_strided_slice %97 {offsets = [16, 0], sizes = [16, 32], strides = [1, 1]} : vector<32x32xf32> to vector<16x32xf32>
    %100 = arith.subf %98, %99 : vector<16x32xf32>
    %101 = arith.mulf %100, %100 : vector<16x32xf32>
    %cst_66 = arith.constant 0.000000e+00 : f32
    %102 = vector.broadcast %cst_66 : f32 to vector<16x32xf32>
    %103 = arith.subf %102, %101 : vector<16x32xf32>
    %104 = math.exp %103 : vector<16x32xf32>
    %105 = arith.truncf %104 : vector<16x32xf32> to vector<16x32xbf16>
    %c9 = arith.constant 9 : index
    %c0_67 = arith.constant 0 : index
    %c0_68 = arith.constant 0 : index
    %106 = vector.load %arg4[%c9, %c0_67, %c0_68] : memref<12x32x32xbf16, #tpu.memory_space<vmem>>, vector<1x32x32xbf16>
    %107 = vector.shape_cast %106 : vector<1x32x32xbf16> to vector<32x32xbf16>
    %cst_69 = arith.constant dense<0.000000e+00> : vector<16x32xf32>
    %108 = tpu.matmul %105, %107, %cst_69 {dimension_numbers = #tpu.dot_dimension_numbers<[1], [0], [0], [1], [0, 0, 1, 1], [], []>} : vector<16x32xbf16>, vector<32x32xbf16>, vector<16x32xf32> -> vector<16x32xf32>
    %109 = arith.addf %55, %108 : vector<16x32xf32>
    %c8_70 = arith.constant 8 : index
    %c0_71 = arith.constant 0 : index
    %110 = vector.load %arg5[%c8_70, %c0_71] : memref<12x128xf32, #tpu.memory_space<vmem>>, vector<1x32xf32>
    %111 = vector.broadcast %110 : vector<1x32xf32> to vector<16x32xf32>
    %112 = arith.addf %109, %111 : vector<16x32xf32>
    %cst_72 = arith.constant 0.000000e+00 : f32
    %113 = vector.broadcast %cst_72 : f32 to vector<16x32xf32>
    %114 = arith.maximumf %112, %113 : vector<16x32xf32>
    %115 = arith.truncf %114 : vector<16x32xf32> to vector<16x32xbf16>
    %c10 = arith.constant 10 : index
    %c0_73 = arith.constant 0 : index
    %c0_74 = arith.constant 0 : index
    %116 = vector.load %arg4[%c10, %c0_73, %c0_74] : memref<12x32x32xbf16, #tpu.memory_space<vmem>>, vector<1x32x32xbf16>
    %117 = vector.shape_cast %116 : vector<1x32x32xbf16> to vector<32x32xbf16>
    %cst_75 = arith.constant dense<0.000000e+00> : vector<16x32xf32>
    %118 = tpu.matmul %115, %117, %cst_75 {dimension_numbers = #tpu.dot_dimension_numbers<[1], [0], [0], [1], [0, 0, 1, 1], [], []>} : vector<16x32xbf16>, vector<32x32xbf16>, vector<16x32xf32> -> vector<16x32xf32>
    %c9_76 = arith.constant 9 : index
    %c0_77 = arith.constant 0 : index
    %119 = vector.load %arg5[%c9_76, %c0_77] : memref<12x128xf32, #tpu.memory_space<vmem>>, vector<1x32xf32>
    %120 = vector.broadcast %119 : vector<1x32xf32> to vector<16x32xf32>
    %121 = arith.addf %118, %120 : vector<16x32xf32>
    %122 = math.tanh %121 : vector<16x32xf32>
    %123 = arith.truncf %122 : vector<16x32xf32> to vector<16x32xbf16>
    %c11 = arith.constant 11 : index
    %c0_78 = arith.constant 0 : index
    %c0_79 = arith.constant 0 : index
    %124 = vector.load %arg4[%c11, %c0_78, %c0_79] : memref<12x32x32xbf16, #tpu.memory_space<vmem>>, vector<1x32x32xbf16>
    %125 = vector.shape_cast %124 : vector<1x32x32xbf16> to vector<32x32xbf16>
    %cst_80 = arith.constant dense<0.000000e+00> : vector<16x32xf32>
    %126 = tpu.matmul %123, %125, %cst_80 {dimension_numbers = #tpu.dot_dimension_numbers<[1], [0], [0], [1], [0, 0, 1, 1], [], []>} : vector<16x32xbf16>, vector<32x32xbf16>, vector<16x32xf32> -> vector<16x32xf32>
    %c10_81 = arith.constant 10 : index
    %c0_82 = arith.constant 0 : index
    %127 = vector.load %arg5[%c10_81, %c0_82] : memref<12x128xf32, #tpu.memory_space<vmem>>, vector<1x32xf32>
    %128 = vector.broadcast %127 : vector<1x32xf32> to vector<16x32xf32>
    %129 = arith.addf %126, %128 : vector<16x32xf32>
    %cst_83 = arith.constant 0.000000e+00 : f32
    %130 = vector.broadcast %cst_83 : f32 to vector<16x32xf32>
    %131 = arith.maximumf %129, %130 : vector<16x32xf32>
    %132 = arith.truncf %131 : vector<16x32xf32> to vector<16x32xbf16>
    %c0_84 = arith.constant 0 : index
    %c0_85 = arith.constant 0 : index
    %133 = vector.load %arg6[%c0_84, %c0_85] : memref<32x128xbf16, #tpu.memory_space<vmem>>, vector<32x128xbf16>
    %cst_86 = arith.constant dense<0.000000e+00> : vector<16x128xf32>
    %134 = tpu.matmul %132, %133, %cst_86 {dimension_numbers = #tpu.dot_dimension_numbers<[1], [0], [0], [1], [0, 0, 1, 1], [], []>} : vector<16x32xbf16>, vector<32x128xbf16>, vector<16x128xf32> -> vector<16x128xf32>
    %c11_87 = arith.constant 11 : index
    %c0_88 = arith.constant 0 : index
    %135 = vector.load %arg5[%c11_87, %c0_88] : memref<12x128xf32, #tpu.memory_space<vmem>>, vector<1x128xf32>
    %136 = vector.broadcast %135 : vector<1x128xf32> to vector<16x128xf32>
    %137 = arith.addf %134, %136 : vector<16x128xf32>
    %138 = arith.negf %137 : vector<16x128xf32>
    %139 = math.exp %138 : vector<16x128xf32>
    %cst_89 = arith.constant 1.000000e+00 : f32
    %140 = vector.broadcast %cst_89 : f32 to vector<16x128xf32>
    %141 = arith.addf %140, %139 : vector<16x128xf32>
    %142 = arith.divf %140, %141 : vector<16x128xf32>
    %c0_90 = arith.constant 0 : index
    %c0_91 = arith.constant 0 : index
    %143 = vector.load %arg7[%c0_90, %c0_91] : memref<16x128xf32, #tpu.memory_space<vmem>>, vector<16x128xf32>
    tpu.vector_store %arg7[%c0_90, %c0_91], %142 {strides = array<i32>} : memref<16x128xf32, #tpu.memory_space<vmem>>, vector<16x128xf32>,
    return
  }
  func.func @transform_0(%arg0: i32) -> (i32, i32) {
    %c0_i32 = arith.constant 0 : i32
    %c0_i32_0 = arith.constant 0 : i32
    return %arg0, %c0_i32 : i32, i32
  }
  func.func @transform_1(%arg0: i32) -> (i32, i32) {
    %c0_i32 = arith.constant 0 : i32
    %c0_i32_0 = arith.constant 0 : i32
    return %arg0, %c0_i32 : i32, i32
  }
  func.func @transform_2(%arg0: i32) -> (i32, i32) {
    %c0_i32 = arith.constant 0 : i32
    %c0_i32_0 = arith.constant 0 : i32
    return %arg0, %c0_i32 : i32, i32
  }
  func.func @transform_3(%arg0: i32) -> (i32, i32, i32) {
    %c0_i32 = arith.constant 0 : i32
    %c0_i32_0 = arith.constant 0 : i32
    %c0_i32_1 = arith.constant 0 : i32
    %c0_i32_2 = arith.constant 0 : i32
    return %c0_i32, %c0_i32_0, %c0_i32_1 : i32, i32, i32
  }
  func.func @transform_4(%arg0: i32) -> (i32, i32) {
    %c0_i32 = arith.constant 0 : i32
    %c0_i32_0 = arith.constant 0 : i32
    %c0_i32_1 = arith.constant 0 : i32
    return %c0_i32, %c0_i32_0 : i32, i32
  }
  func.func @transform_5(%arg0: i32) -> (i32, i32) {
    %c0_i32 = arith.constant 0 : i32
    %c0_i32_0 = arith.constant 0 : i32
    %c0_i32_1 = arith.constant 0 : i32
    return %c0_i32, %c0_i32_0 : i32, i32
  }
  func.func @transform_6(%arg0: i32) -> (i32, i32) {
    %c0_i32 = arith.constant 0 : i32
    %c0_i32_0 = arith.constant 0 : i32
    return %arg0, %c0_i32 : i32, i32
  }
}

</mosaic_0001>

<bundles_post_ra>
// kernel: tpu_custom_call.1
= control target key start
LH: loop header
LB: loop body
LE: loop exit
PB: predicated region body
PF: predicated region fallthrough
CT: control target
= control target key end

     0   :  { %11 = vsyncpa [#allocation3], 0  ;;  %s5484_s0 = inlined_call_operand.vmem [shape: f32[512,32], index: 0, kind: input, shape index: {}]   ;;  %s5485_s1 = inlined_call_operand.vmem [shape: bf16[512,256], index: 1, kind: input, shape index: {}]   ;;  %s5486_s2 = inlined_call_operand.vmem [shape: bf16[64,256], index: 2, kind: input, shape index: {}]   ;;  %s5487_s3 = inlined_call_operand.hbm [shape: bf16[12,32,32], index: 3, kind: input, shape index: {}]   ;;  %s5488_s4 = inlined_call_operand.vmem [shape: f32[12,128], index: 4, kind: input, shape index: {}]   ;;  %s5489_s5 = inlined_call_operand.vmem [shape: bf16[32,128], index: 5, kind: input, shape index: {}]   ;;  %s5490_s6 = inlined_call_operand.hbm [shape: f32[32,128], index: 6, kind: output, shape index: {}]  }
   0x1   :  { %12 = vsyncpa [#allocation4], 0 }
   0x2   :  { %14 = vsyncpa [#allocation4 + $0x1], 0  ;;  %s4544_s21 = smov 0   ;;  %s4546_s22 = smov 0  }
   0x3   :  { %s4548_s23 = smov 0   ;;  %s4550_s24 = smov 0  }
   0x4 LB: > { %s4565_s25 = sadd.s32 4294967295, %s4499_s24   ;;  %s3358_s26 = sadd.s32 4294967294, %s4499_s24   ;;  %s4499_s24 = sphi %s4550_s24, %s5498_s24   ;;  %s4495_s23 = sphi %s4548_s23, %s5497_s23   ;;  %s4491_s22 = sphi %s4546_s22, %s5496_s22   ;;  %s4487_s21 = sphi %s4544_s21, %s5495_s21  }
   0x5   : > { %s4569_s27 = sadd.s32 1, %s4499_s24   ;;  %s168_s28 = sadd.s32 1, %s4495_s23 }
   0x6   : > { %s165_s29 = ssub.s32 %s4499_s24, %s4569_s27  ;;  %p178_p0 = scmp.ne.s32.totalorder %s4495_s23, %s4491_s22 }
   0x7   : > { %p166_p1 = scmp.eq.s32.totalorder %s165_s29, 0  ;;  %p179_p2 = scmp.eq.s32.totalorder %s4565_s25, 1 }
   0x8   : > { %p184_p3 = scmp.ne.s32.totalorder %s4491_s22, %s4487_s21  ;;  %p185_p4 = scmp.eq.s32.totalorder %s3358_s26, 1 }
   0x9   : > { %s4580_s30 = scalar_select %p166_p1, %s4495_s23, %s168_s28  }
   0xa   : > { %p4582_p5 = por %p179_p2, %p178_p0  ;;  %p4586_p6 = por %p185_p4, %p184_p3 }
   0xb   : > { %p3359_p7 = scmp.ge.s32.totalorder %s4499_s24, 1  ;;  %p192_p8 = scmp.lt.s32.totalorder %s4499_s24, 3 }
   0xc   : > { %s5492_s8 = scalar_select %p4586_p6, 1, 0 }
   0xd   : > { %p4259_p9 = scmp.eq.s32.totalorder %s4565_s25, 0  ;;  %p4593_p10 = pnand %p3359_p7, %p192_p8 }
   0xe   : > { %s4501_s10 = smov [#allocation2]  }
   0xf   : > { %s204_s11 = sshll.u32 %s4501_s10, 4  ;;  %p4251_p11 = pneg %p4593_p10  ;;  %s205_s11 = int_to_ptr.vmem [resolvable:$true] %s204_s11 }
  0x10   : > { %s4420_s12 = scalar_lea.vmem %s205_s11, 3072  ;;  %p4428_p3 = scmp.lt.s32.totalorder %s205_s11, %s205_s11 }
  0x11   : > { %p4252_p12 = pnand %p4259_p9, %p4251_p11  ;;  %p4421_p0 = scmp.ne.s32.totalorder %s205_s11, %s4420_s12 }
  0x12   : > { %p4429_p4 = scmp.lt.s32.totalorder %s4420_s12, %s4420_s12 }
  0x13   : > { %p4411_p13 = pneg %p4252_p12 }
  0x14   : > { %p4430_p6 = por %p4429_p4, %p4428_p3 }
  0x15   : > { %p4423_p1 = pnand %p4421_p0, %p4411_p13 }
  0x17   : > { %p4424_p2 = pneg %p4423_p1 }
  0x19   : > { %p4431_p7 = pnand %p4430_p6, %p4424_p2 }
  0x1b   : > { %4434 = shalt.err (!%p4431_p7)
}
  0x1c   : > { %s4502_s13 = smov 64   ;;  %s4503_s14 = smov 4  }
  0x1d   : > { %4254 = dma.hbm_to_vmem [thread:$0]  (!%p4252_p12), %s5487_s3, 3072, %s205_s11, [#allocation3], %s4502_s13, %s4502_s13, %s4503_s14  }
  0x1e   : > { %255 = sbr.rel (%p4593_p10) target bundleno = 3283 (0xcd3), region = 44 }
  0x23   : > { %4478 = dma.done.wait (%p4259_p9), [#allocation3], 3072  }
  0x24   : > { %4480 = vsyncadd (%p4259_p9), [#allocation3], 4294964224  ;;  %s3365_s17 = sshll.u32 %s4565_s25, 5  ;;  %vm775_vm0 = vcmask 261120   ;;  %s3370_s16 = sshll.u32 %s4565_s25, 2  ;;  %vm4505_vm1 = vmmov 0  }
  0x25   : > { %p298_p8 = scmp.lt.s32.totalorder %s3365_s17, 63  ;;  %p311_p6 = scmp.lt.s32.totalorder %s3370_s16, 7 }
  0x26   : > { %s294_s13 = sand.u32 1, %s4491_s22   ;;  %s3561_s15 = sshll.u32 %s4565_s25, 8 }
  0x27   : > { %s5500_s17 = smov (!%p298_p8, %s3365_s17), 63  ;;  %s5502_s16 = smov (!%p311_p6, %s3370_s16), 7 }
  0x28   : > { %s3366_s18 = sshll.u32 %s5500_s17, 3  ;;  %s3560_s17 = sshll.u32 %s5502_s16, 3 }
  0x29   : > { %s4614_s26 = scalar_lea.vmem %s5484_s0, %s3366_s18  ;;  %s4633_s9 = scalar_lea.vmem %s5485_s1, %s3366_s18 }
  0x2a   : > { %v349_v0 = vld [vmem:[%s4614_s26 + $0xf0] sm:$0xff]  ;;  %v350_v1 = vld [vmem:[%s4614_s26 + $0xf8] sm:$0xff]  ;;  %v347_v5 = vld [vmem:[%s4614_s26 + $0xe0] sm:$0xff]  ;;  %s4970_s20 = scalar_lea.vmem %s5486_s2, %s3560_s17  ;;  %s3364_s14 = sshll.u32 %s294_s13, 4 }
  0x2b   : > { %v333_v2 = vld [vmem:[%s4614_s26 + $0x70] sm:$0xff]  ;;  %v421_v3 = vpack.c.bf16 %v350_v1, %v349_v0  ;;  %v334_v4 = vld [vmem:[%s4614_s26 + $0x78] sm:$0xff]  ;;  %v348_v6 = vld [vmem:[%s4614_s26 + $0xe8] sm:$0xff]  ;;  %s296_s16 = scalar_lea.vmem [#allocation5], %s3364_s14  ;;  %s4506_s25 = smov [#allocation5]  }
  0x2c   : > { %v413_v7 = vpack.c.bf16 %v334_v4, %v333_v2  ;;  %v420_v8 = vpack.c.bf16 %v348_v6, %v347_v5  ;;  %v331_v9 = vld [vmem:[%s4614_s26 + $0x60] sm:$0xff]  ;;  %v332_v10 = vld [vmem:[%s4614_s26 + $0x68] sm:$0xff]  ;;  %v345_v11 = vld [vmem:[%s4614_s26 + $0xd0] sm:$0xff]  ;;  %s3260_s17 = sshll.u32 %s296_s16, 4  ;;  %s4439_s29 = sshll.u32 %s4506_s25, 4  ;;  %s5442_s17 = int_to_ptr.vmem [resolvable:$true] %s3260_s17  ;;  %s4440_s29 = int_to_ptr.vmem [resolvable:$false] %s4439_s29 }
  0x2d   : > { %3562 = vmatprep.subr.bf16.mxu0 %v421_v3  ;;  %v346_v12 = vld [vmem:[%s4614_s26 + $0xd8] sm:$0xff]  ;;  %v412_v13 = vpack.c.bf16 %v332_v10, %v331_v9  ;;  %v329_v15 = vld [vmem:[%s4614_s26 + $0x50] sm:$0xff]  ;;  %v343_v17 = vld [vmem:[%s4614_s26 + $0xc0] sm:$0xff]  ;;  %s4435_s28 = scalar_lea.vmem %s5442_s17, 256  ;;  %p4442_p12 = scmp.lt.s32.totalorder %s5442_s17, %s4440_s29 }
  0x2e   : > { %3563 = vmatpush3.bf16.msra.mxu0 %v413_v7  ;;  %v419_v14 = vpack.c.bf16 %v346_v12, %v345_v11  ;;  %v330_v16 = vld [vmem:[%s4614_s26 + $0x58] sm:$0xff]  ;;  %v344_v18 = vld [vmem:[%s4614_s26 + $0xc8] sm:$0xff]  ;;  %v327_v21 = vld [vmem:[%s4614_s26 + $0x40] sm:$0xff]  ;;  %p4436_p9 = scmp.ne.s32.totalorder %s5442_s17, %s4435_s28 }
  0x2f   : > { %3564 = vmatprep.subr.bf16.mxu0 %v420_v8  ;;  %v411_v19 = vpack.c.bf16 %v330_v16, %v329_v15  ;;  %v418_v20 = vpack.c.bf16 %v344_v18, %v343_v17  ;;  %v328_v22 = vld [vmem:[%s4614_s26 + $0x48] sm:$0xff]  ;;  %v341_v23 = vld [vmem:[%s4614_s26 + $0xb0] sm:$0xff]  ;;  %v342_v24 = vld [vmem:[%s4614_s26 + $0xb8] sm:$0xff] }
  0x30   : > { %v4303_v25 = vld [vmem:[%s4633_s9 + $0x4] ss:$8 sps:$4 sm:$0xff]   ;;  %v410_v26 = vpack.c.bf16 %v328_v22, %v327_v21  ;;  %v325_v27 = vld [vmem:[%s4614_s26 + $0x30] sm:$0xff]  ;;  %v417_v28 = vpack.c.bf16 %v342_v24, %v341_v23  ;;  %v326_v29 = vld [vmem:[%s4614_s26 + $0x38] sm:$0xff]  ;;  %p4437_p10 = pnand %p4436_p9, %p4582_p5 }
  0x31   : > { %614 = vmatprep.mubr.bf16.mxu0 %v4303_v25  ;;  %v339_v30 = vld [vmem:[%s4614_s26 + $0xa0] sm:$0xff]  ;;  %v340_v31 = vld [vmem:[%s4614_s26 + $0xa8] sm:$0xff]  ;;  %v409_v32 = vpack.c.bf16 %v326_v29, %v325_v27  ;;  %v337_v36 = vld [vmem:[%s4614_s26 + $0x90] sm:$0xff] }
  0x32   : > { %3565 = vmatpush3.bf16.msra.mxu0 %v412_v13  ;;  %v323_v33 = vld [vmem:[%s4614_s26 + $0x20] sm:$0xff]  ;;  %v416_v34 = vpack.c.bf16 %v340_v31, %v339_v30  ;;  %v324_v35 = vld [vmem:[%s4614_s26 + $0x28] sm:$0xff]  ;;  %v338_v37 = vld [vmem:[%s4614_s26 + $0x98] sm:$0xff]  ;;  %p4438_p11 = pneg %p4437_p10 }
  0x33   : > { %3566 = vmatprep.subr.bf16.mxu0 %v419_v14  ;;  %v408_v38 = vpack.c.bf16 %v324_v35, %v323_v33  ;;  %v321_v39 = vld [vmem:[%s4614_s26 + $0x10] sm:$0xff]  ;;  %v415_v40 = vpack.c.bf16 %v338_v37, %v337_v36  ;;  %v322_v41 = vld [vmem:[%s4614_s26 + $0x18] sm:$0xff]  ;;  %v335_v42 = vld [vmem:[%s4614_s26 + $0x80] sm:$0xff] }
  0x34   : > { %v336_v43 = vld [vmem:[%s4614_s26 + $0x88] sm:$0xff]  ;;  %v407_v44 = vpack.c.bf16 %v322_v41, %v321_v39  ;;  %v319_v45 = vld [vmem:[%s4614_s26] sm:$0xff]  ;;  %v4304_v50 = vld [vmem:[%s4633_s9 + $0x14] ss:$8 sps:$4 sm:$0xff]  }
  0x35   : > { %v414_v46 = vpack.c.bf16 %v336_v43, %v335_v42  ;;  %v320_v47 = vld [vmem:[%s4614_s26 + $0x8] sm:$0xff]  ;;  %v4306_v51 = vld [vmem:[%s4633_s9 + $0x10] ss:$8 sps:$4 sm:$0xff]   ;;  %v4662_v54 = vld [vmem:[%s4633_s9 + $0x34] ss:$8 sps:$4 sm:$0xff]   ;;  %s5444_s26 = scalar_lea.sflag [#allocation4], %s294_s13 }
  0x36   : > { %3567 = vmatpush3.bf16.msra.mxu0 %v411_v19  ;;  %v406_v48 = vpack.c.bf16 %v320_v47, %v319_v45  ;;  %v4301_v49 = vld [vmem:[%s4633_s9] ss:$8 sps:$4 sm:$0xff]   ;;  %v4307_v52 = vld [vmem:[%s4633_s9 + $0x24] ss:$8 sps:$4 sm:$0xff]   ;;  %v4667_v55 = vld [vmem:[%s4633_s9 + $0x30] ss:$8 sps:$4 sm:$0xff]  }
  0x37   : > { %3568 = vmatprep.subr.bf16.mxu0 %v418_v20  ;;  %v4659_v53 = vld [vmem:[%s4633_s9 + $0x20] ss:$8 sps:$4 sm:$0xff]   ;;  %v4670_v56 = vld [vmem:[%s4633_s9 + $0x44] ss:$8 sps:$4 sm:$0xff]   ;;  %v4678_v58 = vld [vmem:[%s4633_s9 + $0x54] ss:$8 sps:$4 sm:$0xff]  }
  0x38   : > { %v4675_v57 = vld [vmem:[%s4633_s9 + $0x40] ss:$8 sps:$4 sm:$0xff]   ;;  %v4683_v59 = vld [vmem:[%s4633_s9 + $0x50] ss:$8 sps:$4 sm:$0xff]   ;;  %v4686_v60 = vld [vmem:[%s4633_s9 + $0x64] ss:$8 sps:$4 sm:$0xff]  }
  0x39   : > { %v4691_v61 = vld [vmem:[%s4633_s9 + $0x60] ss:$8 sps:$4 sm:$0xff]   ;;  %v4694_v62 = vld [vmem:[%s4633_s9 + $0x74] ss:$8 sps:$4 sm:$0xff]   ;;  %v4699_v63 = vld [vmem:[%s4633_s9 + $0x70] ss:$8 sps:$4 sm:$0xff]  }
  0x3a   : > { %3569 = vmatpush3.bf16.msra.mxu0 %v410_v26  ;;  %v4702_v0 = vld [vmem:[%s4633_s9 + $0x84] ss:$8 sps:$4 sm:$0xff]   ;;  %v4707_v1 = vld [vmem:[%s4633_s9 + $0x80] ss:$8 sps:$4 sm:$0xff]   ;;  %v4710_v2 = vld [vmem:[%s4633_s9 + $0x94] ss:$8 sps:$4 sm:$0xff]  }
  0x3b   : > { %3570 = vmatprep.subr.bf16.mxu0 %v417_v28  ;;  %v4715_v3 = vld [vmem:[%s4633_s9 + $0x90] ss:$8 sps:$4 sm:$0xff]   ;;  %v4718_v4 = vld [vmem:[%s4633_s9 + $0xa4] ss:$8 sps:$4 sm:$0xff]   ;;  %v4723_v6 = vld [vmem:[%s4633_s9 + $0xa0] ss:$8 sps:$4 sm:$0xff]  }
  0x3c   : > { %v4349_v5 = vld [vmem:[#allocation2 + $0x8] sm:$0xff]   ;;  %v4726_v7 = vld [vmem:[%s4633_s9 + $0xb4] ss:$8 sps:$4 sm:$0xff]   ;;  %v4350_v8 = vld [vmem:[#allocation2] sm:$0xff]  }
  0x3d   : > { %3973 = vmatprep.subr.bf16.mxu1 %v4349_v5  ;;  %v4731_v9 = vld [vmem:[%s4633_s9 + $0xb0] ss:$8 sps:$4 sm:$0xff]   ;;  %v4734_v10 = vld [vmem:[%s4633_s9 + $0xc4] ss:$8 sps:$4 sm:$0xff]   ;;  %v4739_v11 = vld [vmem:[%s4633_s9 + $0xc0] ss:$8 sps:$4 sm:$0xff]  }
  0x3e   : > { %3571 = vmatpush3.bf16.msra.mxu0 %v409_v32  ;;  %3974 = vmatpush3.bf16.msra.mxu1 %v4349_v5  ;;  %v4742_v12 = vld [vmem:[%s4633_s9 + $0xd4] ss:$8 sps:$4 sm:$0xff]   ;;  %v4747_v13 = vld [vmem:[%s4633_s9 + $0xd0] ss:$8 sps:$4 sm:$0xff]   ;;  %v4750_v14 = vld [vmem:[%s4633_s9 + $0xe4] ss:$8 sps:$4 sm:$0xff]  }
  0x3f   : > { %3572 = vmatprep.subr.bf16.mxu0 %v416_v34  ;;  %3975 = vmatprep.subr.bf16.mxu1 %v4350_v8  ;;  %v4755_v15 = vld [vmem:[%s4633_s9 + $0xe0] ss:$8 sps:$4 sm:$0xff]   ;;  %v4758_v16 = vld [vmem:[%s4633_s9 + $0xf4] ss:$8 sps:$4 sm:$0xff]   ;;  %v4763_v17 = vld [vmem:[%s4633_s9 + $0xf0] ss:$8 sps:$4 sm:$0xff]  }
  0x42   : > { %3573 = vmatpush3.bf16.msra.mxu0 %v408_v38  ;;  %3976 = vmatpush3.bf16.msra.mxu1 %v4350_v8 }
  0x43   : > { %3574 = vmatprep.subr.bf16.mxu0 %v415_v40 }
  0x46   : > { %3575 = vmatpush3.bf16.msra.mxu0 %v407_v44 }
  0x47   : > { %3576 = vmatprep.subr.bf16.mxu0 %v414_v46 }
  0x4a   : > { %3577 = vmatpush3.bf16.msra.mxu0 %v406_v48 }
  0x4d   : > { %615 = vmatmul.mubr.bf16.vlgmr.msra.gmra.mxu0 %v4301_v49 }
  0x4e   : > { %622 = vmatprep.mubr.bf16.mxu0 %v4304_v50 }
  0x55   : > { %623 = vmatmul.mubr.bf16.gmra.mxu0 %v4306_v51 }
  0x56   : > { %630 = vmatprep.mubr.bf16.mxu0 %v4307_v52 }
  0x5d   : > { %631 = vmatmul.mubr.bf16.gmra.mxu0 %v4659_v53 }
  0x5e   : > { %638 = vmatprep.mubr.bf16.mxu0 %v4662_v54 }
  0x65   : > { %639 = vmatmul.mubr.bf16.gmra.mxu0 %v4667_v55 }
  0x66   : > { %646 = vmatprep.mubr.bf16.mxu0 %v4670_v56 }
  0x6d   : > { %647 = vmatmul.mubr.bf16.gmra.mxu0 %v4675_v57 }
  0x6e   : > { %654 = vmatprep.mubr.bf16.mxu0 %v4678_v58 }
  0x75   : > { %655 = vmatmul.mubr.bf16.gmra.mxu0 %v4683_v59 }
  0x76   : > { %662 = vmatprep.mubr.bf16.mxu0 %v4686_v60 }
  0x7d   : > { %663 = vmatmul.mubr.bf16.gmra.mxu0 %v4691_v61 }
  0x7e   : > { %670 = vmatprep.mubr.bf16.mxu0 %v4694_v62 }
  0x85   : > { %671 = vmatmul.mubr.bf16.gmra.mxu0 %v4699_v63 }
  0x86   : > { %678 = vmatprep.mubr.bf16.mxu0 %v4702_v0 }
  0x8d   : > { %679 = vmatmul.mubr.bf16.gmra.mxu0 %v4707_v1 }
  0x8e   : > { %686 = vmatprep.mubr.bf16.mxu0 %v4710_v2 }
  0x95   : > { %687 = vmatmul.mubr.bf16.gmra.mxu0 %v4715_v3 }
  0x96   : > { %694 = vmatprep.mubr.bf16.mxu0 %v4718_v4 }
  0x9d   : > { %695 = vmatmul.mubr.bf16.gmra.mxu0 %v4723_v6 }
  0x9e   : > { %702 = vmatprep.mubr.bf16.mxu0 %v4726_v7 }
  0xa5   : > { %703 = vmatmul.mubr.bf16.gmra.mxu0 %v4731_v9 }
  0xa6   : > { %710 = vmatprep.mubr.bf16.mxu0 %v4734_v10 }
  0xad   : > { %711 = vmatmul.mubr.bf16.gmra.mxu0 %v4739_v11 }
  0xae   : > { %718 = vmatprep.mubr.bf16.mxu0 %v4742_v12 }
  0xb5   : > { %719 = vmatmul.mubr.bf16.gmra.mxu0 %v4747_v13 }
  0xb6   : > { %726 = vmatprep.mubr.bf16.mxu0 %v4750_v14 }
  0xbd   : > { %727 = vmatmul.mubr.bf16.gmra.mxu0 %v4755_v15 }
  0xbe   : > { %734 = vmatprep.mubr.bf16.mxu0 %v4758_v16 }
  0xc5   : > { %735 = vmatmul.mubr.bf16.gmra.mxu0 %v4763_v17 }
 0x10d   : > { %v3578_v18 = vpop.f32.mrf.mxu0 }
 0x10f   : > { %v3579_v19 = vpop.f32.mrf.mxu0 }
 0x110   : > { %v3580_v22 = vadd.f32 %v3579_v19, %v3578_v18 }
 0x111   : > { %v3581_v20 = vpop.f32.mrf.mxu0 }
 0x113   : > { %v3582_v21 = vpop.f32.mrf.mxu0 }
 0x114   : > { %v3583_v23 = vadd.f32 %v3582_v21, %v3581_v20 }
 0x115   : > { %v3584_v24 = vpop.f32.mrf.mxu0 }
 0x116   : > { %v743_v25 = vpack.c.bf16 %v3583_v23, %v3580_v22 }
 0x117   : > { %v3585_v26 = vpop.f32.mrf.mxu0 }
 0x118   : > { %3977 = vmatprep.mubr.msk.bf16.mxu1 %vm775_vm0, %v743_v25  ;;  %v3586_v29 = vadd.f32 %v3585_v26, %v3584_v24 }
 0x119   : > { %v3587_v27 = vpop.f32.mrf.mxu0 }
 0x11b   : > { %v3588_v28 = vpop.f32.mrf.mxu0 }
 0x11c   : > { %v3589_v30 = vadd.f32 %v3588_v28, %v3587_v27 }
 0x11d   : > { %v3590_v31 = vpop.f32.mrf.mxu0 }
 0x11e   : > { %v744_v32 = vpack.c.bf16 %v3589_v30, %v3586_v29 }
 0x11f   : > { %v3591_v33 = vpop.f32.mrf.mxu0 }
 0x120   : > { %3978 = vmatmul.mubr.msk.bf16.vlgmr.msra.gmra.mxu1 %vm775_vm0, %v744_v32  ;;  %v3592_v36 = vadd.f32 %v3591_v33, %v3590_v31 }
 0x121   : > { %v3593_v34 = vpop.f32.mrf.mxu0 }
 0x123   : > { %v3594_v35 = vpop.f32.mrf.mxu0 }
 0x124   : > { %v3595_v37 = vadd.f32 %v3594_v35, %v3593_v34 }
 0x125   : > { %v3596_v38 = vpop.f32.mrf.mxu0 }
 0x126   : > { %v745_v39 = vpack.c.bf16 %v3595_v37, %v3592_v36 }
 0x127   : > { %v3597_v40 = vpop.f32.mrf.mxu0 }
 0x128   : > { %3981 = vmatprep.mubr.msk.bf16.mxu1 %vm775_vm0, %v745_v39  ;;  %v3598_v43 = vadd.f32 %v3597_v40, %v3596_v38 }
 0x129   : > { %v3599_v41 = vpop.f32.mrf.mxu0 }
 0x12b   : > { %v3600_v42 = vpop.f32.mrf.mxu0 }
 0x12c   : > { %v3601_v44 = vadd.f32 %v3600_v42, %v3599_v41 }
 0x12d   : > { %v3602_v45 = vpop.f32.mrf.mxu0 }
 0x12e   : > { %v746_v46 = vpack.c.bf16 %v3601_v44, %v3598_v43 }
 0x12f   : > { %v3603_v47 = vpop.f32.mrf.mxu0 }
 0x130   : > { %3982 = vmatmul.mubr.msk.bf16.gmra.mxu1 %vm775_vm0, %v746_v46  ;;  %v3604_v50 = vadd.f32 %v3603_v47, %v3602_v45 }
 0x131   : > { %v3605_v48 = vpop.f32.mrf.mxu0 }
 0x133   : > { %v3606_v49 = vpop.f32.mrf.mxu0 }
 0x134   : > { %v3607_v51 = vadd.f32 %v3606_v49, %v3605_v48 }
 0x135   : > { %v3608_v52 = vpop.f32.mrf.mxu0 }
 0x136   : > { %v747_v5 = vpack.c.bf16 %v3607_v51, %v3604_v50 }
 0x137   : > { %v3609_v8 = vpop.f32.mrf.mxu0 }
 0x138   : > { %3985 = vmatprep.mubr.msk.bf16.mxu1 %vm775_vm0, %v747_v5  ;;  %v3610_v20 = vadd.f32 %v3609_v8, %v3608_v52 }
 0x139   : > { %v3611_v18 = vpop.f32.mrf.mxu0 }
 0x13b   : > { %v3612_v19 = vpop.f32.mrf.mxu0 }
 0x13c   : > { %v3613_v21 = vadd.f32 %v3612_v19, %v3611_v18 }
 0x13d   : > { %v3614_v22 = vpop.f32.mrf.mxu0 }
 0x13e   : > { %v748_v23 = vpack.c.bf16 %v3613_v21, %v3610_v20  ;;  %v4351_v20 = vld [vmem:[#allocation2 + $0x18] sm:$0xff]  }
 0x13f   : > { %v3615_v24 = vpop.f32.mrf.mxu0  ;;  %4009 = vmatprep.subr.bf16.mxu1 %v4351_v20 }
 0x140   : > { %3986 = vmatmul.mubr.msk.bf16.gmra.mxu1 %vm775_vm0, %v748_v23  ;;  %v3616_v27 = vadd.f32 %v3615_v24, %v3614_v22  ;;  %v4352_v24 = vld [vmem:[#allocation2 + $0x10] sm:$0xff]  }
 0x141   : > { %v3617_v25 = vpop.f32.mrf.mxu0  ;;  %4010 = vmatpush3.bf16.msra.mxu1 %v4351_v20 }
 0x142   : > { %4011 = vmatprep.subr.bf16.mxu1 %v4352_v24 }
 0x143   : > { %v3618_v26 = vpop.f32.mrf.mxu0 }
 0x144   : > { %v3619_v28 = vadd.f32 %v3618_v26, %v3617_v25 }
 0x145   : > { %v3620_v29 = vpop.f32.mrf.mxu0  ;;  %4012 = vmatpush3.bf16.msra.mxu1 %v4352_v24 }
 0x146   : > { %v749_v30 = vpack.c.bf16 %v3619_v28, %v3616_v27 }
 0x147   : > { %v3621_v31 = vpop.f32.mrf.mxu0 }
 0x148   : > { %3989 = vmatprep.mubr.msk.bf16.mxu1 %vm775_vm0, %v749_v30  ;;  %v3622_v34 = vadd.f32 %v3621_v31, %v3620_v29 }
 0x149   : > { %v3623_v32 = vpop.f32.mrf.mxu0 }
 0x14b   : > { %v3624_v33 = vpop.f32.mrf.mxu0 }
 0x14c   : > { %v3625_v35 = vadd.f32 %v3624_v33, %v3623_v32 }
 0x14d   : > { %v3626_v36 = vpop.f32.mrf.mxu0 }
 0x14e   : > { %v750_v37 = vpack.c.bf16 %v3625_v35, %v3622_v34 }
 0x14f   : > { %v3627_v38 = vpop.f32.mrf.mxu0 }
 0x150   : > { %3990 = vmatmul.mubr.msk.bf16.gmra.mxu1 %vm775_vm0, %v750_v37  ;;  %v3628_v41 = vadd.f32 %v3627_v38, %v3626_v36 }
 0x151   : > { %v3629_v39 = vpop.f32.mrf.mxu0 }
 0x153   : > { %v3630_v40 = vpop.f32.mrf.mxu0 }
 0x154   : > { %v3631_v42 = vadd.f32 %v3630_v40, %v3629_v39 }
 0x155   : > { %v3632_v43 = vpop.f32.mrf.mxu0 }
 0x156   : > { %v751_v44 = vpack.c.bf16 %v3631_v42, %v3628_v41 }
 0x157   : > { %v3633_v45 = vpop.f32.mrf.mxu0 }
 0x158   : > { %3993 = vmatprep.mubr.msk.bf16.mxu1 %vm775_vm0, %v751_v44  ;;  %v3634_v48 = vadd.f32 %v3633_v45, %v3632_v43 }
 0x159   : > { %v3635_v46 = vpop.f32.mrf.mxu0 }
 0x15b   : > { %v3636_v47 = vpop.f32.mrf.mxu0 }
 0x15c   : > { %v3637_v49 = vadd.f32 %v3636_v47, %v3635_v46 }
 0x15d   : > { %v3638_v50 = vpop.f32.mrf.mxu0 }
 0x15e   : > { %v752_v51 = vpack.c.bf16 %v3637_v49, %v3634_v48 }
 0x15f   : > { %v3639_v52 = vpop.f32.mrf.mxu0 }
 0x160   : > { %3994 = vmatmul.mubr.msk.bf16.gmra.mxu1 %vm775_vm0, %v752_v51  ;;  %v3640_v18 = vadd.f32 %v3639_v52, %v3638_v50 }
 0x161   : > { %v3641_v5 = vpop.f32.mrf.mxu0 }
 0x163   : > { %v3642_v8 = vpop.f32.mrf.mxu0 }
 0x164   : > { %v3643_v19 = vadd.f32 %v3642_v8, %v3641_v5 }
 0x165   : > { %v3644_v21 = vpop.f32.mrf.mxu0 }
 0x166   : > { %v753_v22 = vpack.c.bf16 %v3643_v19, %v3640_v18 }
 0x167   : > { %v3645_v23 = vpop.f32.mrf.mxu0 }
 0x168   : > { %3997 = vmatprep.mubr.msk.bf16.mxu1 %vm775_vm0, %v753_v22  ;;  %v3646_v27 = vadd.f32 %v3645_v23, %v3644_v21  ;;  %v4785_v23 = vld [vmem:[%s5488_s4] ss:$0 sm:$0xff] }
 0x169   : > { %v3647_v25 = vpop.f32.mrf.mxu0 }
 0x16b   : > { %v3648_v26 = vpop.f32.mrf.mxu0 }
 0x16c   : > { %v3649_v28 = vadd.f32 %v3648_v26, %v3647_v25 }
 0x16d   : > { %v3650_v29 = vpop.f32.mrf.mxu0 }
 0x16e   : > { %v754_v30 = vpack.c.bf16 %v3649_v28, %v3646_v27 }
 0x16f   : > { %v3651_v31 = vpop.f32.mrf.mxu0 }
 0x170   : > { %3998 = vmatmul.mubr.msk.bf16.gmra.mxu1 %vm775_vm0, %v754_v30  ;;  %v3652_v34 = vadd.f32 %v3651_v31, %v3650_v29 }
 0x171   : > { %v3653_v32 = vpop.f32.mrf.mxu0 }
 0x173   : > { %v3654_v33 = vpop.f32.mrf.mxu0 }
 0x174   : > { %v3655_v35 = vadd.f32 %v3654_v33, %v3653_v32 }
 0x175   : > { %v3656_v36 = vpop.f32.mrf.mxu0 }
 0x176   : > { %v755_v37 = vpack.c.bf16 %v3655_v35, %v3652_v34 }
 0x177   : > { %v3657_v38 = vpop.f32.mrf.mxu0 }
 0x178   : > { %4001 = vmatprep.mubr.msk.bf16.mxu1 %vm775_vm0, %v755_v37  ;;  %v3658_v41 = vadd.f32 %v3657_v38, %v3656_v36 }
 0x179   : > { %v3659_v39 = vpop.f32.mrf.mxu0 }
 0x17b   : > { %v3660_v40 = vpop.f32.mrf.mxu0 }
 0x17c   : > { %v3661_v42 = vadd.f32 %v3660_v40, %v3659_v39 }
 0x17d   : > { %v3662_v43 = vpop.f32.mrf.mxu0 }
 0x17e   : > { %v756_v44 = vpack.c.bf16 %v3661_v42, %v3658_v41 }
 0x17f   : > { %v3663_v45 = vpop.f32.mrf.mxu0 }
 0x180   : > { %4002 = vmatmul.mubr.msk.bf16.gmra.mxu1 %vm775_vm0, %v756_v44  ;;  %v3664_v48 = vadd.f32 %v3663_v45, %v3662_v43 }
 0x181   : > { %v3665_v46 = vpop.f32.mrf.mxu0 }
 0x183   : > { %v3666_v47 = vpop.f32.mrf.mxu0 }
 0x184   : > { %v3667_v49 = vadd.f32 %v3666_v47, %v3665_v46 }
 0x185   : > { %v3668_v50 = vpop.f32.mrf.mxu0 }
 0x186   : > { %v757_v51 = vpack.c.bf16 %v3667_v49, %v3664_v48 }
 0x187   : > { %v3669_v52 = vpop.f32.mrf.mxu0 }
 0x188   : > { %4005 = vmatprep.mubr.msk.bf16.mxu1 %vm775_vm0, %v757_v51  ;;  %v3670_v18 = vadd.f32 %v3669_v52, %v3668_v50 }
 0x189   : > { %v3671_v5 = vpop.f32.mrf.mxu0 }
 0x18b   : > { %v3672_v8 = vpop.f32.mrf.mxu0 }
 0x18c   : > { %v3673_v19 = vadd.f32 %v3672_v8, %v3671_v5 }
 0x18e   : > { %v758_v20 = vpack.c.bf16 %v3673_v19, %v3670_v18 }
 0x190   : > { %4006 = vmatmul.mubr.msk.bf16.gmra.mxu1 %vm775_vm0, %v758_v20 }
 0x1e0   : > { %v3979_v21 = vpop.f32.mrf.mxu1 }
 0x1e1   : > { %v867_v27 = vadd.f32 %v3979_v21, %v4785_v23 }
 0x1e2   : > { %v858_v22 = vpop.f32.mrf.mxu1 }
 0x1e3   : > { %v859_v25 = vadd.f32 %v4785_v23, %v858_v22  ;;  %v987_v33 = vmax.f32 %v867_v27, 0.0 }
 0x1e4   : > { %v3980_v24 = vpop.f32.mrf.mxu1 }
 0x1e5   : > { %v870_v26 = vadd.f32 %v3980_v24, %v4785_v23  ;;  %v985_v31 = vmax.f32 %v859_v25, 0.0 }
 0x1e6   : > { %v861_v28 = vpop.f32.mrf.mxu1 }
 0x1e7   : > { %v862_v29 = vadd.f32 %v4785_v23, %v861_v28  ;;  %v988_v30 = vmax.f32 %v870_v26, 0.0 }
 0x1e9   : > { %v986_v32 = vmax.f32 %v862_v29, 0.0  ;;  %v1018_v35 = vpack.c.bf16 %v988_v30, %v987_v33 }
 0x1eb   : > { %v1017_v34 = vpack.c.bf16 %v986_v32, %v985_v31 }
 0x1ed   : > { %4013 = vmatprep.mubr.msk.bf16.mxu1 %vm775_vm0, %v1017_v34 }
 0x1ee   : > { %4014 = vmatmul.mubr.msk.bf16.vlgmr.msra.gmra.mxu1 %vm775_vm0, %v1018_v35 }
 0x1f0   : > { %v3983_v36 = vpop.f32.mrf.mxu1 }
 0x1f1   : > { %v883_v41 = vadd.f32 %v3983_v36, %v4785_v23 }
 0x1f2   : > { %v874_v37 = vpop.f32.mrf.mxu1 }
 0x1f3   : > { %v875_v39 = vadd.f32 %v4785_v23, %v874_v37  ;;  %v991_v47 = vmax.f32 %v883_v41, 0.0 }
 0x1f4   : > { %v3984_v38 = vpop.f32.mrf.mxu1 }
 0x1f5   : > { %v886_v40 = vadd.f32 %v3984_v38, %v4785_v23  ;;  %v989_v45 = vmax.f32 %v875_v39, 0.0 }
 0x1f6   : > { %v877_v42 = vpop.f32.mrf.mxu1 }
 0x1f7   : > { %v878_v43 = vadd.f32 %v4785_v23, %v877_v42  ;;  %v992_v44 = vmax.f32 %v886_v40, 0.0 }
 0x1f9   : > { %v990_v46 = vmax.f32 %v878_v43, 0.0  ;;  %v1020_v49 = vpack.c.bf16 %v992_v44, %v991_v47 }
 0x1fb   : > { %v1019_v48 = vpack.c.bf16 %v990_v46, %v989_v45 }
 0x1fd   : > { %4017 = vmatprep.mubr.msk.bf16.mxu1 %vm775_vm0, %v1019_v48 }
 0x1fe   : > { %4018 = vmatmul.mubr.msk.bf16.gmra.mxu1 %vm775_vm0, %v1020_v49 }
 0x200   : > { %v3987_v50 = vpop.f32.mrf.mxu1 }
 0x201   : > { %v899_v18 = vadd.f32 %v3987_v50, %v4785_v23 }
 0x202   : > { %v890_v51 = vpop.f32.mrf.mxu1 }
 0x203   : > { %v891_v5 = vadd.f32 %v4785_v23, %v890_v51  ;;  %v995_v25 = vmax.f32 %v899_v18, 0.0 }
 0x204   : > { %v3988_v52 = vpop.f32.mrf.mxu1 }
 0x205   : > { %v902_v8 = vadd.f32 %v3988_v52, %v4785_v23  ;;  %v993_v22 = vmax.f32 %v891_v5, 0.0 }
 0x206   : > { %v893_v19 = vpop.f32.mrf.mxu1 }
 0x207   : > { %v894_v20 = vadd.f32 %v4785_v23, %v893_v19  ;;  %v996_v21 = vmax.f32 %v902_v8, 0.0 }
 0x209   : > { %v994_v24 = vmax.f32 %v894_v20, 0.0  ;;  %v1022_v27 = vpack.c.bf16 %v996_v21, %v995_v25  ;;  %v4353_v21 = vld [vmem:[#allocation2 + $0x28] sm:$0xff]  }
 0x20a   : > { %4045 = vmatprep.subr.bf16.mxu1 %v4353_v21 }
 0x20b   : > { %v1021_v26 = vpack.c.bf16 %v994_v24, %v993_v22  ;;  %4046 = vmatpush3.bf16.msra.mxu1 %v4353_v21 }
 0x20d   : > { %4021 = vmatprep.mubr.msk.bf16.mxu1 %vm775_vm0, %v1021_v26 }
 0x20e   : > { %4022 = vmatmul.mubr.msk.bf16.gmra.mxu1 %vm775_vm0, %v1022_v27 }
 0x210   : > { %v3991_v28 = vpop.f32.mrf.mxu1 }
 0x211   : > { %v915_v33 = vadd.f32 %v3991_v28, %v4785_v23  ;;  %v4354_v28 = vld [vmem:[#allocation2 + $0x20] sm:$0xff]  }
 0x212   : > { %v906_v29 = vpop.f32.mrf.mxu1  ;;  %4047 = vmatprep.subr.bf16.mxu1 %v4354_v28 }
 0x213   : > { %v907_v31 = vadd.f32 %v4785_v23, %v906_v29  ;;  %v999_v39 = vmax.f32 %v915_v33, 0.0  ;;  %4048 = vmatpush3.bf16.msra.mxu1 %v4354_v28 }
 0x214   : > { %v3992_v30 = vpop.f32.mrf.mxu1 }
 0x215   : > { %v918_v32 = vadd.f32 %v3992_v30, %v4785_v23  ;;  %v997_v37 = vmax.f32 %v907_v31, 0.0 }
 0x216   : > { %v909_v34 = vpop.f32.mrf.mxu1 }
 0x217   : > { %v910_v35 = vadd.f32 %v4785_v23, %v909_v34  ;;  %v1000_v36 = vmax.f32 %v918_v32, 0.0 }
 0x219   : > { %v998_v38 = vmax.f32 %v910_v35, 0.0  ;;  %v1024_v41 = vpack.c.bf16 %v1000_v36, %v999_v39 }
 0x21b   : > { %v1023_v40 = vpack.c.bf16 %v998_v38, %v997_v37 }
 0x21d   : > { %4025 = vmatprep.mubr.msk.bf16.mxu1 %vm775_vm0, %v1023_v40 }
 0x21e   : > { %4026 = vmatmul.mubr.msk.bf16.gmra.mxu1 %vm775_vm0, %v1024_v41 }
 0x220   : > { %v3995_v42 = vpop.f32.mrf.mxu1 }
 0x221   : > { %v931_v47 = vadd.f32 %v3995_v42, %v4785_v23 }
 0x222   : > { %v922_v43 = vpop.f32.mrf.mxu1 }
 0x223   : > { %v923_v45 = vadd.f32 %v4785_v23, %v922_v43  ;;  %v1003_v5 = vmax.f32 %v931_v47, 0.0 }
 0x224   : > { %v3996_v44 = vpop.f32.mrf.mxu1 }
 0x225   : > { %v934_v46 = vadd.f32 %v3996_v44, %v4785_v23  ;;  %v1001_v51 = vmax.f32 %v923_v45, 0.0 }
 0x226   : > { %v925_v48 = vpop.f32.mrf.mxu1 }
 0x227   : > { %v926_v49 = vadd.f32 %v4785_v23, %v925_v48  ;;  %v1004_v50 = vmax.f32 %v934_v46, 0.0 }
 0x229   : > { %v1002_v52 = vmax.f32 %v926_v49, 0.0  ;;  %v1026_v18 = vpack.c.bf16 %v1004_v50, %v1003_v5 }
 0x22b   : > { %v1025_v8 = vpack.c.bf16 %v1002_v52, %v1001_v51 }
 0x22d   : > { %4029 = vmatprep.mubr.msk.bf16.mxu1 %vm775_vm0, %v1025_v8 }
 0x22e   : > { %4030 = vmatmul.mubr.msk.bf16.gmra.mxu1 %vm775_vm0, %v1026_v18 }
 0x230   : > { %v3999_v19 = vpop.f32.mrf.mxu1 }
 0x231   : > { %v947_v26 = vadd.f32 %v3999_v19, %v4785_v23 }
 0x232   : > { %v938_v20 = vpop.f32.mrf.mxu1 }
 0x233   : > { %v939_v24 = vadd.f32 %v4785_v23, %v938_v20  ;;  %v1007_v33 = vmax.f32 %v947_v26, 0.0 }
 0x234   : > { %v4000_v22 = vpop.f32.mrf.mxu1 }
 0x235   : > { %v950_v25 = vadd.f32 %v4000_v22, %v4785_v23  ;;  %v1005_v31 = vmax.f32 %v939_v24, 0.0 }
 0x236   : > { %v941_v27 = vpop.f32.mrf.mxu1 }
 0x237   : > { %v942_v29 = vadd.f32 %v4785_v23, %v941_v27  ;;  %v1008_v30 = vmax.f32 %v950_v25, 0.0 }
 0x239   : > { %v1006_v32 = vmax.f32 %v942_v29, 0.0  ;;  %v1028_v35 = vpack.c.bf16 %v1008_v30, %v1007_v33  ;;  %v4838_v30 = vld [vmem:[%s5488_s4 + $0x1] ss:$0 sm:$0xff] }
 0x23b   : > { %v1027_v34 = vpack.c.bf16 %v1006_v32, %v1005_v31 }
 0x23d   : > { %4033 = vmatprep.mubr.msk.bf16.mxu1 %vm775_vm0, %v1027_v34 }
 0x23e   : > { %4034 = vmatmul.mubr.msk.bf16.gmra.mxu1 %vm775_vm0, %v1028_v35 }
 0x240   : > { %v4003_v36 = vpop.f32.mrf.mxu1 }
 0x241   : > { %v963_v41 = vadd.f32 %v4003_v36, %v4785_v23 }
 0x242   : > { %v954_v37 = vpop.f32.mrf.mxu1 }
 0x243   : > { %v955_v39 = vadd.f32 %v4785_v23, %v954_v37  ;;  %v1011_v47 = vmax.f32 %v963_v41, 0.0 }
 0x244   : > { %v4004_v38 = vpop.f32.mrf.mxu1 }
 0x245   : > { %v966_v40 = vadd.f32 %v4004_v38, %v4785_v23  ;;  %v1009_v45 = vmax.f32 %v955_v39, 0.0 }
 0x246   : > { %v957_v42 = vpop.f32.mrf.mxu1 }
 0x247   : > { %v958_v43 = vadd.f32 %v4785_v23, %v957_v42  ;;  %v1012_v44 = vmax.f32 %v966_v40, 0.0 }
 0x249   : > { %v1010_v46 = vmax.f32 %v958_v43, 0.0  ;;  %v1030_v49 = vpack.c.bf16 %v1012_v44, %v1011_v47 }
 0x24b   : > { %v1029_v48 = vpack.c.bf16 %v1010_v46, %v1009_v45 }
 0x24d   : > { %4037 = vmatprep.mubr.msk.bf16.mxu1 %vm775_vm0, %v1029_v48 }
 0x24e   : > { %4038 = vmatmul.mubr.msk.bf16.gmra.mxu1 %vm775_vm0, %v1030_v49 }
 0x250   : > { %v4007_v50 = vpop.f32.mrf.mxu1 }
 0x251   : > { %v979_v18 = vadd.f32 %v4007_v50, %v4785_v23 }
 0x252   : > { %v970_v51 = vpop.f32.mrf.mxu1 }
 0x253   : > { %v971_v5 = vadd.f32 %v4785_v23, %v970_v51  ;;  %v1015_v25 = vmax.f32 %v979_v18, 0.0 }
 0x254   : > { %v4008_v52 = vpop.f32.mrf.mxu1 }
 0x255   : > { %v982_v8 = vadd.f32 %v4008_v52, %v4785_v23  ;;  %v1013_v22 = vmax.f32 %v971_v5, 0.0 }
 0x256   : > { %v973_v19 = vpop.f32.mrf.mxu1 }
 0x257   : > { %v974_v20 = vadd.f32 %v4785_v23, %v973_v19  ;;  %v1016_v21 = vmax.f32 %v982_v8, 0.0 }
 0x259   : > { %v1014_v24 = vmax.f32 %v974_v20, 0.0  ;;  %v1032_v27 = vpack.c.bf16 %v1016_v21, %v1015_v25 }
 0x25b   : > { %v1031_v26 = vpack.c.bf16 %v1014_v24, %v1013_v22 }
 0x25d   : > { %4041 = vmatprep.mubr.msk.bf16.mxu1 %vm775_vm0, %v1031_v26 }
 0x25e   : > { %4042 = vmatmul.mubr.msk.bf16.gmra.mxu1 %vm775_vm0, %v1032_v27 }
 0x2ae   : > { %v4015_v28 = vpop.f32.mrf.mxu1 }
 0x2af   : > { %v1140_v33 = vadd.f32 %v4015_v28, %v4838_v30 }
 0x2b0   : > { %v1131_v29 = vpop.f32.mrf.mxu1 }
 0x2b1   : > { %v1132_v23 = vadd.f32 %v4838_v30, %v1131_v29  ;;  %v1260_v39 = vmax.f32 %v1140_v33, 0.0 }
 0x2b2   : > { %v4016_v31 = vpop.f32.mrf.mxu1 }
 0x2b3   : > { %v1143_v32 = vadd.f32 %v4016_v31, %v4838_v30  ;;  %v1258_v37 = vmax.f32 %v1132_v23, 0.0 }
 0x2b4   : > { %v1134_v34 = vpop.f32.mrf.mxu1 }
 0x2b5   : > { %v1135_v35 = vadd.f32 %v4838_v30, %v1134_v34  ;;  %v1261_v36 = vmax.f32 %v1143_v32, 0.0 }
 0x2b7   : > { %v1259_v38 = vmax.f32 %v1135_v35, 0.0  ;;  %v4846_v41 = vpack.c.bf16 %v1261_v36, %v1260_v39 }
 0x2b9   : > { %v4844_v40 = vpack.c.bf16 %v1259_v38, %v1258_v37 }
 0x2bb   : > { %4049 = vmatprep.mubr.msk.bf16.mxu1 %vm775_vm0, %v4844_v40 }
 0x2bc   : > { %4050 = vmatmul.mubr.msk.bf16.vlgmr.msra.gmra.mxu1 %vm775_vm0, %v4846_v41 }
 0x2be   : > { %v4019_v42 = vpop.f32.mrf.mxu1 }
 0x2bf   : > { %v1156_v47 = vadd.f32 %v4019_v42, %v4838_v30 }
 0x2c0   : > { %v1147_v43 = vpop.f32.mrf.mxu1 }
 0x2c1   : > { %v1148_v45 = vadd.f32 %v4838_v30, %v1147_v43  ;;  %v1264_v5 = vmax.f32 %v1156_v47, 0.0 }
 0x2c2   : > { %v4020_v44 = vpop.f32.mrf.mxu1 }
 0x2c3   : > { %v1159_v46 = vadd.f32 %v4020_v44, %v4838_v30  ;;  %v1262_v51 = vmax.f32 %v1148_v45, 0.0 }
 0x2c4   : > { %v1150_v48 = vpop.f32.mrf.mxu1 }
 0x2c5   : > { %v1151_v49 = vadd.f32 %v4838_v30, %v1150_v48  ;;  %v1265_v50 = vmax.f32 %v1159_v46, 0.0 }
 0x2c7   : > { %v1263_v52 = vmax.f32 %v1151_v49, 0.0  ;;  %v4858_v18 = vpack.c.bf16 %v1265_v50, %v1264_v5 }
 0x2c9   : > { %v4856_v8 = vpack.c.bf16 %v1263_v52, %v1262_v51 }
 0x2cb   : > { %4053 = vmatprep.mubr.msk.bf16.mxu1 %vm775_vm0, %v4856_v8 }
 0x2cc   : > { %4054 = vmatmul.mubr.msk.bf16.gmra.mxu1 %vm775_vm0, %v4858_v18 }
 0x2ce   : > { %v4023_v19 = vpop.f32.mrf.mxu1 }
 0x2cf   : > { %v1172_v25 = vadd.f32 %v4023_v19, %v4838_v30 }
 0x2d0   : > { %v1163_v20 = vpop.f32.mrf.mxu1 }
 0x2d1   : > { %v1164_v22 = vadd.f32 %v4838_v30, %v1163_v20  ;;  %v1268_v23 = vmax.f32 %v1172_v25, 0.0 }
 0x2d2   : > { %v4024_v21 = vpop.f32.mrf.mxu1 }
 0x2d3   : > { %v1175_v24 = vadd.f32 %v4024_v21, %v4838_v30  ;;  %v1266_v29 = vmax.f32 %v1164_v22, 0.0 }
 0x2d4   : > { %v1166_v26 = vpop.f32.mrf.mxu1 }
 0x2d5   : > { %v1167_v27 = vadd.f32 %v4838_v30, %v1166_v26  ;;  %v1269_v28 = vmax.f32 %v1175_v24, 0.0 }
 0x2d7   : > { %v1267_v31 = vmax.f32 %v1167_v27, 0.0  ;;  %v4870_v33 = vpack.c.bf16 %v1269_v28, %v1268_v23 }
 0x2d9   : > { %v4868_v32 = vpack.c.bf16 %v1267_v31, %v1266_v29 }
 0x2db   : > { %4057 = vmatprep.mubr.msk.bf16.mxu1 %vm775_vm0, %v4868_v32 }
 0x2dc   : > { %4058 = vmatmul.mubr.msk.bf16.gmra.mxu1 %vm775_vm0, %v4870_v33 }
 0x2de   : > { %v4027_v34 = vpop.f32.mrf.mxu1 }
 0x2df   : > { %v1188_v39 = vadd.f32 %v4027_v34, %v4838_v30 }
 0x2e0   : > { %v1179_v35 = vpop.f32.mrf.mxu1 }
 0x2e1   : > { %v1180_v37 = vadd.f32 %v4838_v30, %v1179_v35  ;;  %v1272_v47 = vmax.f32 %v1188_v39, 0.0 }
 0x2e2   : > { %v4028_v36 = vpop.f32.mrf.mxu1 }
 0x2e3   : > { %v1191_v38 = vadd.f32 %v4028_v36, %v4838_v30  ;;  %v1270_v45 = vmax.f32 %v1180_v37, 0.0 }
 0x2e4   : > { %v1182_v42 = vpop.f32.mrf.mxu1 }
 0x2e5   : > { %v1183_v43 = vadd.f32 %v4838_v30, %v1182_v42  ;;  %v1273_v44 = vmax.f32 %v1191_v38, 0.0 }
 0x2e7   : > { %v1271_v46 = vmax.f32 %v1183_v43, 0.0  ;;  %v4882_v49 = vpack.c.bf16 %v1273_v44, %v1272_v47 }
 0x2e9   : > { %v4880_v48 = vpack.c.bf16 %v1271_v46, %v1270_v45 }
 0x2eb   : > { %4061 = vmatprep.mubr.msk.bf16.mxu1 %vm775_vm0, %v4880_v48 }
 0x2ec   : > { %4062 = vmatmul.mubr.msk.bf16.gmra.mxu1 %vm775_vm0, %v4882_v49 }
 0x2ee   : > { %v4031_v50 = vpop.f32.mrf.mxu1 }
 0x2ef   : > { %v1204_v20 = vadd.f32 %v4031_v50, %v4838_v30 }
 0x2f0   : > { %v1195_v51 = vpop.f32.mrf.mxu1 }
 0x2f1   : > { %v1196_v5 = vadd.f32 %v4838_v30, %v1195_v51  ;;  %v1276_v27 = vmax.f32 %v1204_v20, 0.0 }
 0x2f2   : > { %v4032_v52 = vpop.f32.mrf.mxu1 }
 0x2f3   : > { %v1207_v19 = vadd.f32 %v4032_v52, %v4838_v30  ;;  %v1274_v25 = vmax.f32 %v1196_v5, 0.0 }
 0x2f4   : > { %v1198_v21 = vpop.f32.mrf.mxu1 }
 0x2f5   : > { %v1199_v22 = vadd.f32 %v4838_v30, %v1198_v21  ;;  %v1277_v24 = vmax.f32 %v1207_v19, 0.0 }
 0x2f7   : > { %v1275_v26 = vmax.f32 %v1199_v22, 0.0  ;;  %v4894_v29 = vpack.c.bf16 %v1277_v24, %v1276_v27 }
 0x2f9   : > { %v4892_v28 = vpack.c.bf16 %v1275_v26, %v1274_v25 }
 0x2fb   : > { %4065 = vmatprep.mubr.msk.bf16.mxu1 %vm775_vm0, %v4892_v28 }
 0x2fc   : > { %4066 = vmatmul.mubr.msk.bf16.gmra.mxu1 %vm775_vm0, %v4894_v29 }
 0x2fe   : > { %v4035_v31 = vpop.f32.mrf.mxu1 }
 0x2ff   : > { %v1220_v37 = vadd.f32 %v4035_v31, %v4838_v30 }
 0x300   : > { %v1211_v23 = vpop.f32.mrf.mxu1 }
 0x301   : > { %v1212_v35 = vadd.f32 %v4838_v30, %v1211_v23  ;;  %v1280_v45 = vmax.f32 %v1220_v37, 0.0 }
 0x302   : > { %v4036_v34 = vpop.f32.mrf.mxu1 }
 0x303   : > { %v1223_v36 = vadd.f32 %v4036_v34, %v4838_v30  ;;  %v1278_v43 = vmax.f32 %v1212_v35, 0.0 }
 0x304   : > { %v1214_v38 = vpop.f32.mrf.mxu1 }
 0x305   : > { %v1215_v39 = vadd.f32 %v4838_v30, %v1214_v38  ;;  %v1281_v42 = vmax.f32 %v1223_v36, 0.0 }
 0x307   : > { %v1279_v44 = vmax.f32 %v1215_v39, 0.0  ;;  %v1301_v47 = vpack.c.bf16 %v1281_v42, %v1280_v45 }
 0x309   : > { %v1300_v46 = vpack.c.bf16 %v1279_v44, %v1278_v43 }
 0x30b   : > { %4069 = vmatprep.mubr.msk.bf16.mxu1 %vm775_vm0, %v1300_v46 }
 0x30c   : > { %4070 = vmatmul.mubr.msk.bf16.gmra.mxu1 %vm775_vm0, %v1301_v47 }
 0x30e   : > { %v4039_v50 = vpop.f32.mrf.mxu1 }
 0x30f   : > { %v1236_v20 = vadd.f32 %v4039_v50, %v4838_v30 }
 0x310   : > { %v1227_v51 = vpop.f32.mrf.mxu1 }
 0x311   : > { %v1228_v5 = vadd.f32 %v4838_v30, %v1227_v51  ;;  %v1284_v27 = vmax.f32 %v1236_v20, 0.0 }
 0x312   : > { %v4040_v52 = vpop.f32.mrf.mxu1 }
 0x313   : > { %v1239_v19 = vadd.f32 %v4040_v52, %v4838_v30  ;;  %v1282_v25 = vmax.f32 %v1228_v5, 0.0 }
 0x314   : > { %v1230_v21 = vpop.f32.mrf.mxu1 }
 0x315   : > { %v1231_v22 = vadd.f32 %v4838_v30, %v1230_v21  ;;  %v1285_v24 = vmax.f32 %v1239_v19, 0.0  ;;  %v4401_v19 = vld [vmem:[%s4633_s9 + $0x4] ss:$8 sps:$4 sm:$0xff]  }
 0x317   : > { %v1283_v26 = vmax.f32 %v1231_v22, 0.0  ;;  %v1303_v23 = vpack.c.bf16 %v1285_v24, %v1284_v27 }
 0x319   : > { %v1302_v31 = vpack.c.bf16 %v1283_v26, %v1282_v25 }
 0x31b   : > { %4073 = vmatprep.mubr.msk.bf16.mxu1 %vm775_vm0, %v1302_v31 }
 0x31c   : > { %4074 = vmatmul.mubr.msk.bf16.gmra.mxu1 %vm775_vm0, %v1303_v23 }
 0x31e   : > { %v4043_v34 = vpop.f32.mrf.mxu1 }
 0x31f   : > { %v1252_v36 = vadd.f32 %v4043_v34, %v4838_v30 }
 0x320   : > { %v1243_v35 = vpop.f32.mrf.mxu1 }
 0x321   : > { %v1244_v38 = vadd.f32 %v4838_v30, %v1243_v35  ;;  %v1288_v43 = vmax.f32 %v1252_v36, 0.0 }
 0x322   : > { %v4044_v37 = vpop.f32.mrf.mxu1 }
 0x323   : > { %v1255_v39 = vadd.f32 %v4044_v37, %v4838_v30  ;;  %v1286_v50 = vmax.f32 %v1244_v38, 0.0 }
 0x324   : > { %v1246_v42 = vpop.f32.mrf.mxu1 }
 0x325   : > { %v1289_v44 = vmax.f32 %v1255_v39, 0.0  ;;  %v1247_v45 = vadd.f32 %v4838_v30, %v1246_v42  ;;  %v4402_v30 = vld [vmem:[%s4633_s9] ss:$8 sps:$4 sm:$0xff]  }
 0x327   : > { %v1305_v51 = vpack.c.bf16 %v1289_v44, %v1288_v43  ;;  %v1287_v52 = vmax.f32 %v1247_v45, 0.0 }
 0x329   : > { %v1304_v5 = vpack.c.bf16 %v1287_v52, %v1286_v50  ;;  %3760 = vmatprep.subr.bf16.mxu1 %v1305_v51 }
 0x32a   : > { %3761 = vmatpush3.bf16.msra.mxu1 %v4882_v49  ;;  %v4357_v49 = vld [vmem:[%s4970_s20 + $0x4] ss:$8 sps:$4 sm:$0xff]  }
 0x32b   : > { %4077 = vmatprep.mubr.msk.bf16.mxu1 %vm775_vm0, %v1304_v5  ;;  %3762 = vmatprep.subr.bf16.mxu1 %v1304_v5 }
 0x32c   : > { %4078 = vmatmul.mubr.msk.bf16.gmra.mxu1 %vm775_vm0, %v1305_v51  ;;  %1635 = vmatprep.mubr.bf16.mxu0 %v4357_v49 }
 0x32d   : > { %1801 = vmatprep.mubr.bf16.mxu1 %v4401_v19 }
 0x32e   : > { %3763 = vmatpush3.bf16.msra.mxu1 %v4880_v48  ;;  %v4404_v48 = vld [vmem:[%s4633_s9 + $0x10] ss:$8 sps:$4 sm:$0xff]  }
 0x32f   : > { %3764 = vmatprep.subr.bf16.mxu1 %v1303_v23 }
 0x332   : > { %3765 = vmatpush3.bf16.msra.mxu1 %v4870_v33  ;;  %v4403_v33 = vld [vmem:[%s4633_s9 + $0x14] ss:$8 sps:$4 sm:$0xff]  }
 0x333   : > { %3766 = vmatprep.subr.bf16.mxu1 %v1302_v31 }
 0x336   : > { %3767 = vmatpush3.bf16.msra.mxu1 %v4868_v32  ;;  %v4405_v32 = vld [vmem:[%s4633_s9 + $0x24] ss:$8 sps:$4 sm:$0xff]   ;;  %s4441_s9 = scalar_lea.vmem %s4440_s29, 512 }
 0x337   : > { %3768 = vmatprep.subr.bf16.mxu1 %v1301_v47  ;;  %p4443_p13 = scmp.lt.s32.totalorder %s4441_s9, %s4435_s28 }
 0x339   : > { %p4444_p0 = por %p4443_p13, %p4442_p12 }
 0x33a   : > { %3769 = vmatpush3.bf16.msra.mxu1 %v4858_v18 }
 0x33b   : > { %3770 = vmatprep.subr.bf16.mxu1 %v1300_v46  ;;  %p4445_p1 = pnand %p4444_p0, %p4438_p11 }
 0x33e   : > { %3771 = vmatpush3.bf16.msra.mxu1 %v4856_v8 }
 0x33f   : > { %3772 = vmatprep.subr.bf16.mxu1 %v4894_v29 }
 0x342   : > { %3773 = vmatpush3.bf16.msra.mxu1 %v4846_v41 }
 0x343   : > { %3774 = vmatprep.subr.bf16.mxu1 %v4892_v28 }
 0x346   : > { %3775 = vmatpush3.bf16.msra.mxu1 %v4844_v40 }
 0x349   : > { %1802 = vmatmul.mubr.bf16.vlgmr.msra.gmra.mxu1 %v4402_v30 }
 0x34a   : > { %1809 = vmatprep.mubr.bf16.mxu1 %v4403_v33 }
 0x351   : > { %1810 = vmatmul.mubr.bf16.gmra.mxu1 %v4404_v48 }
 0x352   : > { %1817 = vmatprep.mubr.bf16.mxu1 %v4405_v32 }
 0x359   : > { %1818 = vmatmul.mubr.bf16.gmra.mxu1 %v4659_v53 }
 0x35a   : > { %1825 = vmatprep.mubr.bf16.mxu1 %v4662_v54  ;;  %v4946_v54 = vld [vmem:[%s5488_s4 + $0x2] ss:$0 sm:$0xff] }
 0x361   : > { %1826 = vmatmul.mubr.bf16.gmra.mxu1 %v4667_v55 }
 0x362   : > { %1833 = vmatprep.mubr.bf16.mxu1 %v4670_v56 }
 0x369   : > { %1834 = vmatmul.mubr.bf16.gmra.mxu1 %v4675_v57 }
 0x36a   : > { %1841 = vmatprep.mubr.bf16.mxu1 %v4678_v58 }
 0x371   : > { %1842 = vmatmul.mubr.bf16.gmra.mxu1 %v4683_v59 }
 0x372   : > { %1849 = vmatprep.mubr.bf16.mxu1 %v4686_v60 }
 0x379   : > { %1850 = vmatmul.mubr.bf16.gmra.mxu1 %v4691_v61 }
 0x37a   : > { %1857 = vmatprep.mubr.bf16.mxu1 %v4694_v62 }
 0x37c   : > { %v4051_v53 = vpop.f32.mrf.mxu1 }
 0x37d   : > { %v1413_v56 = vadd.f32 %v4051_v53, %v4946_v54 }
 0x37e   : > { %v4948_v55 = vpop.f32.mrf.mxu1 }
 0x37f   : > { %v1533_v59 = vmax.f32 %v1413_v56, 0.0 }
 0x380   : > { %v4052_v57 = vpop.f32.mrf.mxu1 }
 0x381   : > { %v1416_v58 = vadd.f32 %v4052_v57, %v4946_v54  ;;  %1858 = vmatmul.mubr.bf16.gmra.mxu1 %v4699_v63 }
 0x382   : > { %1865 = vmatprep.mubr.bf16.mxu1 %v4702_v0  ;;  %v4957_v62 = vpop.f32.mrf.mxu1 }
 0x383   : > { %v1534_v60 = vmax.f32 %v1416_v58, 0.0 }
 0x385   : > { %v4954_v61 = vpack.c.bf16 %v1534_v60, %v1533_v59 }
 0x389   : > { %1866 = vmatmul.mubr.bf16.gmra.mxu1 %v4707_v1 }
 0x38a   : > { %1873 = vmatprep.mubr.bf16.mxu1 %v4710_v2 }
 0x38c   : > { %v4055_v40 = vpop.f32.mrf.mxu1 }
 0x38d   : > { %v1429_v8 = vadd.f32 %v4055_v40, %v4946_v54 }
 0x38e   : > { %v4961_v41 = vpop.f32.mrf.mxu1 }
 0x38f   : > { %v1537_v1 = vmax.f32 %v1429_v8, 0.0 }
 0x390   : > { %v4056_v63 = vpop.f32.mrf.mxu1 }
 0x391   : > { %v1432_v0 = vadd.f32 %v4056_v63, %v4946_v54  ;;  %1874 = vmatmul.mubr.bf16.gmra.mxu1 %v4715_v3 }
 0x392   : > { %1881 = vmatprep.mubr.bf16.mxu1 %v4718_v4  ;;  %v4979_v3 = vpop.f32.mrf.mxu1 }
 0x393   : > { %v1538_v18 = vmax.f32 %v1432_v0, 0.0 }
 0x395   : > { %v4972_v2 = vpack.c.bf16 %v1538_v18, %v1537_v1 }
 0x399   : > { %1882 = vmatmul.mubr.bf16.gmra.mxu1 %v4723_v6 }
 0x39a   : > { %1889 = vmatprep.mubr.bf16.mxu1 %v4726_v7 }
 0x39c   : > { %v4059_v4 = vpop.f32.mrf.mxu1 }
 0x39d   : > { %v1445_v58 = vadd.f32 %v4059_v4, %v4946_v54 }
 0x39e   : > { %v4982_v28 = vpop.f32.mrf.mxu1 }
 0x3a0   : > { %v4060_v29 = vpop.f32.mrf.mxu1 }
 0x3a1   : > { %1890 = vmatmul.mubr.bf16.gmra.mxu1 %v4731_v9  ;;  %v1448_v33 = vadd.f32 %v4060_v29, %v4946_v54  ;;  %v1541_v29 = vmax.f32 %v1445_v58, 0.0 }
 0x3a2   : > { %1897 = vmatprep.mubr.bf16.mxu1 %v4734_v10  ;;  %v1439_v46 = vpop.f32.mrf.mxu1 }
 0x3a3   : > { %v1542_v8 = vmax.f32 %v1448_v33, 0.0  ;;  %v1440_v63 = vadd.f32 %v4946_v54, %v1439_v46 }
 0x3a9   : > { %1898 = vmatmul.mubr.bf16.gmra.mxu1 %v4739_v11 }
 0x3aa   : > { %1905 = vmatprep.mubr.bf16.mxu1 %v4742_v12 }
 0x3ac   : > { %v4063_v6 = vpop.f32.mrf.mxu1 }
 0x3ad   : > { %v1461_v23 = vadd.f32 %v4063_v6, %v4946_v54  ;;  %v1437_v6 = vadd.f32 %v4946_v54, %v4982_v28  ;;  %v1424_v28 = vadd.f32 %v4946_v54, %v4979_v3 }
 0x3ae   : > { %v1452_v7 = vpop.f32.mrf.mxu1 }
 0x3af   : > { %v1545_v50 = vmax.f32 %v1461_v23, 0.0  ;;  %v1453_v51 = vadd.f32 %v4946_v54, %v1452_v7 }
 0x3b0   : > { %v4064_v9 = vpop.f32.mrf.mxu1 }
 0x3b1   : > { %1906 = vmatmul.mubr.bf16.gmra.mxu1 %v4747_v13  ;;  %v1543_v59 = vmax.f32 %v1453_v51, 0.0 }
 0x3b2   : > { %1913 = vmatprep.mubr.bf16.mxu1 %v4750_v14  ;;  %v1455_v10 = vpop.f32.mrf.mxu1 }
 0x3b3   : > { %v1456_v38 = vadd.f32 %v4946_v54, %v1455_v10  ;;  %v1540_v10 = vmax.f32 %v1440_v63, 0.0  ;;  %v4363_v63 = vld [vmem:[#allocation2 + $0x48] sm:$0xff]  }
 0x3b5   : > { %v1544_v32 = vmax.f32 %v1456_v38, 0.0 }
 0x3b7   : > { %v1573_v0 = vpack.c.bf16 %v1544_v32, %v1543_v59  ;;  %v4361_v59 = vld [vmem:[#allocation2 + $0x38] sm:$0xff]  }
 0x3b9   : > { %1914 = vmatmul.mubr.bf16.gmra.mxu1 %v4755_v15 }
 0x3ba   : > { %1921 = vmatprep.mubr.bf16.mxu1 %v4758_v16 }
 0x3bc   : > { %v4990_v11 = vpop.f32.mrf.mxu1 }
 0x3be   : > { %v4992_v12 = vpop.f32.mrf.mxu1 }
 0x3c0   : > { %v4994_v47 = vpop.f32.mrf.mxu1 }
 0x3c1   : > { %1922 = vmatmul.mubr.bf16.gmra.mxu1 %v4763_v17  ;;  %v1464_v17 = vadd.f32 %v4064_v9, %v4946_v54  ;;  %v1572_v9 = vpack.c.bf16 %v1542_v8, %v1541_v29 }
 0x3c2   : > { %2797 = vmatprep.mubr.bf16.mxu1 %v4357_v49  ;;  %v4996_v13 = vpop.f32.mrf.mxu1 }
 0x3c3   : > { %v1546_v37 = vmax.f32 %v1464_v17, 0.0  ;;  %v1472_v3 = vadd.f32 %v4946_v54, %v4996_v13  ;;  %v1405_v13 = vadd.f32 %v4946_v54, %v4948_v55 }
 0x3c5   : > { %v1574_v48 = vpack.c.bf16 %v1546_v37, %v1545_v50  ;;  %v1469_v37 = vadd.f32 %v4946_v54, %v4992_v12  ;;  %v4360_v50 = vld [vmem:[%s4970_s20 + $0x10] ss:$8 sps:$4 sm:$0xff]  }
 0x3cc   : > { %v4071_v14 = vpop.f32.mrf.mxu1 }
 0x3cd   : > { %v1493_v4 = vadd.f32 %v4071_v14, %v4946_v54  ;;  %v1480_v14 = vadd.f32 %v4994_v47, %v4946_v54 }
 0x3ce   : > { %v1484_v20 = vpop.f32.mrf.mxu1 }
 0x3d0   : > { %v4072_v21 = vpop.f32.mrf.mxu1 }
 0x3d1   : > { %v1496_v1 = vadd.f32 %v4072_v21, %v4946_v54  ;;  %v1553_v21 = vmax.f32 %v1493_v4, 0.0 }
 0x3d2   : > { %v1487_v22 = vpop.f32.mrf.mxu1 }
 0x3dc   : > { %v4075_v15 = vpop.f32.mrf.mxu1 }
 0x3dd   : > { %v1509_v52 = vadd.f32 %v4075_v15, %v4946_v54  ;;  %v1554_v15 = vmax.f32 %v1496_v1, 0.0 }
 0x3de   : > { %v1500_v24 = vpop.f32.mrf.mxu1 }
 0x3df   : > { %v1557_v60 = vmax.f32 %v1509_v52, 0.0  ;;  %v1501_v40 = vadd.f32 %v4946_v54, %v1500_v24  ;;  %v1488_v24 = vadd.f32 %v4946_v54, %v1487_v22  ;;  %v1578_v17 = vpack.c.bf16 %v1554_v15, %v1553_v21 }
 0x3e0   : > { %v4076_v16 = vpop.f32.mrf.mxu1  ;;  %v1477_v22 = vadd.f32 %v4990_v11, %v4946_v54 }
 0x3e1   : > { %v1512_v42 = vadd.f32 %v4076_v16, %v4946_v54  ;;  %v1555_v7 = vmax.f32 %v1501_v40, 0.0  ;;  %v1539_v16 = vmax.f32 %v1437_v6, 0.0  ;;  %v4362_v40 = vld [vmem:[#allocation2 + $0x30] sm:$0xff]  }
 0x3e2   : > { %v1503_v25 = vpop.f32.mrf.mxu1  ;;  %v1549_v47 = vmax.f32 %v1477_v22, 0.0 }
 0x3e3   : > { %v1558_v53 = vmax.f32 %v1512_v42, 0.0  ;;  %v1504_v56 = vadd.f32 %v4946_v54, %v1503_v25  ;;  %v1485_v25 = vadd.f32 %v4946_v54, %v1484_v20  ;;  %v1536_v20 = vmax.f32 %v1424_v28, 0.0 }
 0x3e4   : > { %v1547_v42 = vmax.f32 %v1469_v37, 0.0 }
 0x3e5   : > { %v1580_v18 = vpack.c.bf16 %v1558_v53, %v1557_v60  ;;  %v1556_v49 = vmax.f32 %v1504_v56, 0.0  ;;  %v1551_v23 = vmax.f32 %v1485_v25, 0.0 }
 0x3e7   : > { %v1579_v46 = vpack.c.bf16 %v1556_v49, %v1555_v7 }
 0x3ec   : > { %v4079_v26 = vpop.f32.mrf.mxu1 }
 0x3ed   : > { %v1525_v31 = vadd.f32 %v4079_v26, %v4946_v54  ;;  %v1571_v26 = vpack.c.bf16 %v1540_v10, %v1539_v16 }
 0x3ee   : > { %v1516_v27 = vpop.f32.mrf.mxu1 }
 0x3ef   : > { %v1517_v35 = vadd.f32 %v4946_v54, %v1516_v27  ;;  %v1561_v43 = vmax.f32 %v1525_v31, 0.0  ;;  %v1552_v27 = vmax.f32 %v1488_v24, 0.0  ;;  %v1421_v31 = vadd.f32 %v4946_v54, %v4961_v41 }
 0x3f0   : > { %v4080_v34 = vpop.f32.mrf.mxu1  ;;  %v1408_v41 = vadd.f32 %v4946_v54, %v4957_v62  ;;  %v4358_v62 = vld [vmem:[%s4970_s20 + $0x14] ss:$8 sps:$4 sm:$0xff]  }
 0x3f1   : > { %v1528_v36 = vadd.f32 %v4080_v34, %v4946_v54  ;;  %v1559_v5 = vmax.f32 %v1517_v35, 0.0  ;;  %v1550_v34 = vmax.f32 %v1480_v14, 0.0  ;;  %v1577_v35 = vpack.c.bf16 %v1552_v27, %v1551_v23 }
 0x3f2   : > { %v1519_v39 = vpop.f32.mrf.mxu1 }
 0x3f3   : > { %v1562_v44 = vmax.f32 %v1528_v36, 0.0  ;;  %v1520_v45 = vadd.f32 %v4946_v54, %v1519_v39  ;;  %v1535_v36 = vmax.f32 %v1421_v31, 0.0  ;;  %v1576_v38 = vpack.c.bf16 %v1550_v34, %v1549_v47 }
 0x3f4   : > { %v1548_v39 = vmax.f32 %v1472_v3, 0.0 }
 0x3f5   : > { %v1582_v19 = vpack.c.bf16 %v1562_v44, %v1561_v43  ;;  %v1560_v30 = vmax.f32 %v1520_v45, 0.0  ;;  %v1569_v11 = vpack.c.bf16 %v1536_v20, %v1535_v36  ;;  %v1531_v44 = vmax.f32 %v1405_v13, 0.0  ;;  %v4355_v45 = vld [vmem:[%s4970_s20] ss:$8 sps:$4 sm:$0xff]  }
 0x3f6   : > { %v1575_v43 = vpack.c.bf16 %v1548_v39, %v1547_v42 }
 0x3f7   : > { %v1581_v57 = vpack.c.bf16 %v1560_v30, %v1559_v5  ;;  %3728 = vmatprep.subr.bf16.mxu0 %v1582_v19 }
 0x3f8   : > { %3729 = vmatpush3.bf16.msra.mxu0 %v1574_v48 }
 0x3f9   : > { %3730 = vmatprep.subr.bf16.mxu0 %v1581_v57 }
 0x3fc   : > { %3731 = vmatpush3.bf16.msra.mxu0 %v1573_v0 }
 0x3fd   : > { %3732 = vmatprep.subr.bf16.mxu0 %v1580_v18 }
 0x400   : > { %3733 = vmatpush3.bf16.msra.mxu0 %v1572_v9 }
 0x401   : > { %3734 = vmatprep.subr.bf16.mxu0 %v1579_v46 }
 0x404   : > { %3735 = vmatpush3.bf16.msra.mxu0 %v1571_v26 }
 0x405   : > { %3736 = vmatprep.subr.bf16.mxu0 %v1578_v17 }
 0x408   : > { %3737 = vmatpush3.bf16.msra.mxu0 %v4972_v2  ;;  %v1532_v2 = vmax.f32 %v1408_v41, 0.0 }
 0x409   : > { %3738 = vmatprep.subr.bf16.mxu0 %v1577_v35  ;;  %v5040_v51 = vpop.f32.mrf.mxu1 }
 0x40a   : > { %v1567_v12 = vpack.c.bf16 %v1532_v2, %v1531_v44 }
 0x40b   : > { %v5042_v54 = vpop.f32.mrf.mxu1 }
 0x40c   : > { %3739 = vmatpush3.bf16.msra.mxu0 %v1569_v11 }
 0x40d   : > { %3740 = vmatprep.subr.bf16.mxu0 %v1576_v38  ;;  %v5044_v55 = vpop.f32.mrf.mxu1 }
 0x40f   : > { %v5046_v52 = vpop.f32.mrf.mxu1 }
 0x410   : > { %3741 = vmatpush3.bf16.msra.mxu0 %v4954_v61 }
 0x411   : > { %3742 = vmatprep.subr.bf16.mxu0 %v1575_v43  ;;  %v5048_v5 = vpop.f32.mrf.mxu1 }
 0x413   : > { %v5050_v61 = vpop.f32.mrf.mxu1 }
 0x414   : > { %3743 = vmatpush3.bf16.msra.mxu0 %v1567_v12 }
 0x415   : > { %v5052_v19 = vpop.f32.mrf.mxu1  ;;  %4081 = vmatprep.subr.bf16.mxu0 %v4361_v59 }
 0x417   : > { %1636 = vmatmul.mubr.bf16.vlgmr.msra.gmra.mxu0 %v4355_v45  ;;  %v5054_v30 = vpop.f32.mrf.mxu1  ;;  %v3778_v45 = vadd.f32 %v5042_v54, %v5040_v51  ;;  %v3784_v51 = vadd.f32 %v5050_v61, %v5048_v5 }
 0x418   : > { %1643 = vmatprep.mubr.bf16.mxu0 %v4358_v62  ;;  %4082 = vmatpush3.bf16.msra.mxu0 %v4361_v59  ;;  %v3781_v62 = vadd.f32 %v5046_v52, %v5044_v55  ;;  %v3787_v54 = vadd.f32 %v5054_v30, %v5052_v19 }
 0x419   : > { %v5056_v33 = vpop.f32.mrf.mxu1  ;;  %4083 = vmatprep.subr.bf16.mxu0 %v4362_v40 }
 0x41b   : > { %v5058_v48 = vpop.f32.mrf.mxu1 }
 0x41c   : > { %4084 = vmatpush3.bf16.msra.mxu0 %v4362_v40  ;;  %v3790_v55 = vadd.f32 %v5058_v48, %v5056_v33 }
 0x41d   : > { %v5060_v32 = vpop.f32.mrf.mxu1  ;;  %4089 = vmatprep.subr.bf16.mxu0 %v4363_v63 }
 0x41f   : > { %1644 = vmatmul.mubr.bf16.gmra.mxu0 %v4360_v50  ;;  %v5062_v53 = vpop.f32.mrf.mxu1 }
 0x420   : > { %v3793_v52 = vadd.f32 %v5062_v53, %v5060_v32 }
 0x421   : > { %v5064_v56 = vpop.f32.mrf.mxu1 }
 0x423   : > { %v5066_v57 = vpop.f32.mrf.mxu1 }
 0x424   : > { %v3796_v5 = vadd.f32 %v5066_v57, %v5064_v56 }
 0x425   : > { %v5068_v58 = vpop.f32.mrf.mxu1 }
 0x427   : > { %v5070_v60 = vpop.f32.mrf.mxu1 }
 0x428   : > { %v3799_v61 = vadd.f32 %v5070_v60, %v5068_v58 }
 0x429   : > { %v5072_v8 = vpop.f32.mrf.mxu1 }
 0x42a   : > { %v1933_v48 = vpack.c.bf16 %v3799_v61, %v3796_v5 }
 0x42b   : > { %v5074_v0 = vpop.f32.mrf.mxu1 }
 0x42c   : > { %v3802_v19 = vadd.f32 %v5074_v0, %v5072_v8 }
 0x42d   : > { %v5076_v1 = vpop.f32.mrf.mxu1 }
 0x42f   : > { %v5078_v18 = vpop.f32.mrf.mxu1 }
 0x430   : > { %v3805_v30 = vadd.f32 %v5078_v18, %v5076_v1 }
 0x431   : > { %v5080_v49 = vpop.f32.mrf.mxu1 }
 0x432   : > { %v1934_v32 = vpack.c.bf16 %v3805_v30, %v3802_v19 }
 0x433   : > { %v5082_v29 = vpop.f32.mrf.mxu1 }
 0x434   : > { %v3808_v56 = vadd.f32 %v5082_v29, %v5080_v49 }
 0x435   : > { %v5084_v6 = vpop.f32.mrf.mxu1 }
 0x437   : > { %v5086_v4 = vpop.f32.mrf.mxu1 }
 0x438   : > { %v3811_v57 = vadd.f32 %v5086_v4, %v5084_v6 }
 0x439   : > { %v5088_v7 = vpop.f32.mrf.mxu1 }
 0x43a   : > { %v1935_v0 = vpack.c.bf16 %v3811_v57, %v3808_v56  ;;  %v5211_v56 = vld [vmem:[%s5488_s4 + $0x4] ss:$0 sm:$0xff] }
 0x43b   : > { %v5090_v9 = vpop.f32.mrf.mxu1 }
 0x43c   : > { %v3814_v58 = vadd.f32 %v5090_v9, %v5088_v7 }
 0x43d   : > { %v5092_v10 = vpop.f32.mrf.mxu1 }
 0x43f   : > { %v5094_v15 = vpop.f32.mrf.mxu1 }
 0x440   : > { %v3817_v60 = vadd.f32 %v5094_v15, %v5092_v10 }
 0x441   : > { %v5096_v24 = vpop.f32.mrf.mxu1 }
 0x442   : > { %v1936_v1 = vpack.c.bf16 %v3817_v60, %v3814_v58 }
 0x443   : > { %v5098_v46 = vpop.f32.mrf.mxu1 }
 0x444   : > { %v3820_v49 = vadd.f32 %v5098_v46, %v5096_v24 }
 0x445   : > { %v5100_v16 = vpop.f32.mrf.mxu1 }
 0x447   : > { %v5102_v21 = vpop.f32.mrf.mxu1 }
 0x448   : > { %v3823_v29 = vadd.f32 %v5102_v21, %v5100_v16 }
 0x449   : > { %v5104_v25 = vpop.f32.mrf.mxu1 }
 0x44a   : > { %v1937_v9 = vpack.c.bf16 %v3823_v29, %v3820_v49 }
 0x44b   : > { %v5106_v28 = vpop.f32.mrf.mxu1 }
 0x44c   : > { %v3826_v6 = vadd.f32 %v5106_v28, %v5104_v25 }
 0x44d   : > { %v5108_v26 = vpop.f32.mrf.mxu1 }
 0x44f   : > { %v5110_v14 = vpop.f32.mrf.mxu1 }
 0x450   : > { %v3829_v4 = vadd.f32 %v5110_v14, %v5108_v26 }
 0x451   : > { %v5112_v17 = vpop.f32.mrf.mxu1 }
 0x452   : > { %v1938_v10 = vpack.c.bf16 %v3829_v4, %v3826_v6 }
 0x453   : > { %v5114_v27 = vpop.f32.mrf.mxu1 }
 0x454   : > { %v3832_v24 = vadd.f32 %v5114_v27, %v5112_v17 }
 0x455   : > { %v5116_v31 = vpop.f32.mrf.mxu1 }
 0x457   : > { %v5118_v22 = vpop.f32.mrf.mxu1 }
 0x458   : > { %v3835_v46 = vadd.f32 %v5118_v22, %v5116_v31 }
 0x459   : > { %v5120_v23 = vpop.f32.mrf.mxu1 }
 0x45a   : > { %v1939_v28 = vpack.c.bf16 %v3835_v46, %v3832_v24 }
 0x45b   : > { %v5122_v20 = vpop.f32.mrf.mxu1 }
 0x45c   : > { %v3838_v16 = vadd.f32 %v5122_v20, %v5120_v23 }
 0x45d   : > { %v5124_v34 = vpop.f32.mrf.mxu1 }
 0x45f   : > { %v5126_v3 = vpop.f32.mrf.mxu1 }
 0x460   : > { %v3841_v21 = vadd.f32 %v5126_v3, %v5124_v34 }
 0x461   : > { %v5128_v35 = vpop.f32.mrf.mxu1 }
 0x462   : > { %v1940_v26 = vpack.c.bf16 %v3841_v21, %v3838_v16 }
 0x463   : > { %v5130_v37 = vpop.f32.mrf.mxu1 }
 0x464   : > { %v3844_v17 = vadd.f32 %v5130_v37, %v5128_v35 }
 0x465   : > { %v5132_v38 = vpop.f32.mrf.mxu1 }
 0x467   : > { %v5134_v44 = vpop.f32.mrf.mxu1 }
 0x468   : > { %v3847_v27 = vadd.f32 %v5134_v44, %v5132_v38 }
 0x469   : > { %v5141_v59 = vpop.f32.mrf.mxu1 }
 0x46a   : > { %v1941_v20 = vpack.c.bf16 %v3847_v27, %v3844_v17 }
 0x4d7   : > { %v3744_v36 = vpop.f32.mrf.mxu0 }
 0x4d9   : > { %v3745_v47 = vpop.f32.mrf.mxu0 }
 0x4da   : > { %v3746_v39 = vadd.f32 %v3745_v47, %v3744_v36 }
 0x4db   : > { %v3747_v41 = vpop.f32.mrf.mxu0 }
 0x4dd   : > { %v3748_v11 = vpop.f32.mrf.mxu0 }
 0x4de   : > { %v3749_v13 = vadd.f32 %v3748_v11, %v3747_v41  ;;  %v4364_v41 = vld [vmem:[#allocation2 + $0x40] sm:$0xff]   ;;  %v1930_v11 = vpack.c.bf16 %v3781_v62, %v3778_v45 }
 0x4df   : > { %v3750_v42 = vpop.f32.mrf.mxu0 }
 0x4e0   : > { %v1652_v2 = vpack.c.bf16 %v3749_v13, %v3746_v39  ;;  %v3849_v39 = vpop.f32.mrf.mxu1 }
 0x4e1   : > { %v3751_v43 = vpop.f32.mrf.mxu0  ;;  %v3850_v31 = vadd.f32 %v3849_v39, %v5141_v59 }
 0x4e2   : > { %4085 = vmatprep.mubr.msk.bf16.mxu0 %vm775_vm0, %v1652_v2  ;;  %v3752_v40 = vadd.f32 %v3751_v43, %v3750_v42  ;;  %v3851_v13 = vpop.f32.mrf.mxu1  ;;  %v1931_v42 = vpack.c.bf16 %v3787_v54, %v3784_v51  ;;  %v1932_v2 = vpack.c.bf16 %v3793_v52, %v3790_v55 }
 0x4e3   : > { %v3753_v12 = vpop.f32.mrf.mxu0 }
 0x4e5   : > { %v3754_v50 = vpop.f32.mrf.mxu0 }
 0x4e6   : > { %v3755_v36 = vadd.f32 %v3754_v50, %v3753_v12 }
 0x4e8   : > { %v1653_v47 = vpack.c.bf16 %v3755_v36, %v3752_v40  ;;  %v4365_v36 = vld [vmem:[#allocation2 + $0x58] sm:$0xff]  }
 0x4ea   : > { %4086 = vmatmul.mubr.msk.bf16.vlgmr.msra.gmra.mxu0 %vm775_vm0, %v1653_v47  ;;  %v4366_v47 = vld [vmem:[#allocation2 + $0x50] sm:$0xff]  }
 0x4eb   : > { %4090 = vmatpush3.bf16.msra.mxu0 %v4363_v63  ;;  %4093 = vmatprep.mubr.msk.bf16.mxu0 %vm775_vm0, %v1930_v11  ;;  %v3852_v63 = vpop.f32.mrf.mxu1 }
 0x4ec   : > { %4091 = vmatprep.subr.bf16.mxu0 %v4364_v41  ;;  %v3853_v22 = vadd.f32 %v3852_v63, %v3851_v13 }
 0x4ed   : > { %v3854_v33 = vpop.f32.mrf.mxu1 }
 0x4ee   : > { %v1942_v34 = vpack.c.bf16 %v3853_v22, %v3850_v31 }
 0x4ef   : > { %4092 = vmatpush3.bf16.msra.mxu0 %v4364_v41  ;;  %v3855_v53 = vpop.f32.mrf.mxu1  ;;  %v3466_v41 = vld [vmem:[%s5488_s4 + $0x3] ss:$0 sm:$0xff] }
 0x4f0   : > { %v3856_v43 = vadd.f32 %v3855_v53, %v3854_v33  ;;  %4125 = vmatprep.subr.bf16.mxu0 %v4365_v36 }
 0x4f1   : > { %v3857_v8 = vpop.f32.mrf.mxu1 }
 0x4f2   : > { %4094 = vmatmul.mubr.msk.bf16.vlgmr.msra.gmra.mxu0 %vm775_vm0, %v1931_v42 }
 0x4f3   : > { %4097 = vmatprep.mubr.msk.bf16.mxu0 %vm775_vm0, %v1932_v2  ;;  %v3858_v18 = vpop.f32.mrf.mxu1  ;;  %4126 = vmatpush3.bf16.msra.mxu0 %v4365_v36 }
 0x4f4   : > { %v3859_v12 = vadd.f32 %v3858_v18, %v3857_v8  ;;  %4127 = vmatprep.subr.bf16.mxu0 %v4366_v47 }
 0x4f5   : > { %v3860_v7 = vpop.f32.mrf.mxu1 }
 0x4f6   : > { %v1943_v35 = vpack.c.bf16 %v3859_v12, %v3856_v43 }
 0x4f7   : > { %v3861_v15 = vpop.f32.mrf.mxu1  ;;  %4128 = vmatpush3.bf16.msra.mxu0 %v4366_v47 }
 0x4f8   : > { %v3862_v45 = vadd.f32 %v3861_v15, %v3860_v7 }
 0x4f9   : > { %v3863_v25 = vpop.f32.mrf.mxu1 }
 0x4fa   : > { %4098 = vmatmul.mubr.msk.bf16.gmra.mxu0 %vm775_vm0, %v1933_v48 }
 0x4fb   : > { %4101 = vmatprep.mubr.msk.bf16.mxu0 %vm775_vm0, %v1934_v32  ;;  %v3864_v14 = vpop.f32.mrf.mxu1 }
 0x4fc   : > { %v3865_v62 = vadd.f32 %v3864_v14, %v3863_v25 }
 0x4fd   : > { %v3866_v23 = vpop.f32.mrf.mxu1 }
 0x4fe   : > { %v1944_v37 = vpack.c.bf16 %v3865_v62, %v3862_v45 }
 0x4ff   : > { %v3867_v3 = vpop.f32.mrf.mxu1 }
 0x500   : > { %v3868_v38 = vadd.f32 %v3867_v3, %v3866_v23 }
 0x501   : > { %v3869_v50 = vpop.f32.mrf.mxu1 }
 0x502   : > { %4102 = vmatmul.mubr.msk.bf16.gmra.mxu0 %vm775_vm0, %v1935_v0 }
 0x503   : > { %4105 = vmatprep.mubr.msk.bf16.mxu0 %vm775_vm0, %v1936_v1  ;;  %v3870_v40 = vpop.f32.mrf.mxu1 }
 0x504   : > { %v3871_v44 = vadd.f32 %v3870_v40, %v3869_v50 }
 0x506   : > { %v1945_v59 = vpack.c.bf16 %v3871_v44, %v3868_v38 }
 0x50a   : > { %4106 = vmatmul.mubr.msk.bf16.gmra.mxu0 %vm775_vm0, %v1937_v9 }
 0x50b   : > { %4109 = vmatprep.mubr.msk.bf16.mxu0 %vm775_vm0, %v1938_v10 }
 0x512   : > { %4110 = vmatmul.mubr.msk.bf16.gmra.mxu0 %vm775_vm0, %v1939_v28 }
 0x513   : > { %4113 = vmatprep.mubr.msk.bf16.mxu0 %vm775_vm0, %v1940_v26 }
 0x51a   : > { %4114 = vmatmul.mubr.msk.bf16.gmra.mxu0 %vm775_vm0, %v1941_v20 }
 0x51b   : > { %4117 = vmatprep.mubr.msk.bf16.mxu0 %vm775_vm0, %v1942_v34 }
 0x522   : > { %4118 = vmatmul.mubr.msk.bf16.gmra.mxu0 %vm775_vm0, %v1943_v35 }
 0x523   : > { %4121 = vmatprep.mubr.msk.bf16.mxu0 %vm775_vm0, %v1944_v37 }
 0x52a   : > { %4122 = vmatmul.mubr.msk.bf16.gmra.mxu0 %vm775_vm0, %v1945_v59 }
 0x5aa   : > { %v4087_v11 = vpop.f32.mrf.mxu0 }
 0x5ab   : > { %v1719_v39 = vadd.f32 %v4087_v11, %v3466_v41 }
 0x5ac   : > { %v1710_v51 = vpop.f32.mrf.mxu0 }
 0x5ad   : > { %v1711_v54 = vadd.f32 %v3466_v41, %v1710_v51  ;;  %v1727_v52 = vmax.f32 %v1719_v39, 0.0 }
 0x5ae   : > { %v4088_v55 = vpop.f32.mrf.mxu0 }
 0x5af   : > { %v1725_v13 = vmax.f32 %v1711_v54, 0.0  ;;  %v1722_v42 = vadd.f32 %v4088_v55, %v3466_v41 }
 0x5b0   : > { %v1713_v2 = vpop.f32.mrf.mxu0 }
 0x5b1   : > { %v1729_v63 = vsub.f32 %v1725_v13, %v1727_v52  ;;  %v1714_v5 = vadd.f32 %v3466_v41, %v1713_v2  ;;  %v1728_v30 = vmax.f32 %v1722_v42, 0.0 }
 0x5b2   : > { %v4095_v61 = vpop.f32.mrf.mxu0 }
 0x5b3   : > { %v1731_v19 = vmul.f32 %v1729_v63, %v1729_v63  ;;  %v1726_v33 = vmax.f32 %v1714_v5, 0.0  ;;  %v2053_v1 = vadd.f32 %v4095_v61, %v5211_v56 }
 0x5b4   : > { %v2044_v48 = vpop.f32.mrf.mxu0 }
 0x5b5   : > { %v1733_v32 = vsub.f32 0.0, %v1731_v19  ;;  %v1730_v53 = vsub.f32 %v1726_v33, %v1728_v30  ;;  %v2045_v60 = vadd.f32 %v5211_v56, %v2044_v48  ;;  %v2173_v15 = vmax.f32 %v2053_v1, 0.0 }
 0x5b6   : > { %v4096_v57 = vpop.f32.mrf.mxu0 }
 0x5b7   : > { %v1732_v58 = vmul.f32 %v1730_v53, %v1730_v53  ;;  %v2056_v8 = vadd.f32 %v4096_v57, %v5211_v56  ;;  %v1735_v0 = vmul.f32 1.442695, %v1733_v32  ;;  %v2171_v9 = vmax.f32 %v2045_v60, 0.0 }
 0x5b8   : > { %v2047_v18 = vpop.f32.mrf.mxu0 }
 0x5b9   : > { %v1734_v49 = vsub.f32 0.0, %v1732_v58  ;;  %v2048_v29 = vadd.f32 %v5211_v56, %v2047_v18  ;;  %v2174_v6 = vmax.f32 %v2056_v8, 0.0  ;;  %4381 = vpow2.f32 %v1735_v0 }
 0x5ba   : > { %v4099_v4 = vpop.f32.mrf.mxu0 }
 0x5bb   : > { %v1737_v7 = vmul.f32 1.442695, %v1734_v49  ;;  %v2172_v10 = vmax.f32 %v2048_v29, 0.0  ;;  %v2204_v16 = vpack.c.bf16 %v2174_v6, %v2173_v15  ;;  %v2069_v26 = vadd.f32 %v4099_v4, %v5211_v56 }
 0x5bc   : > { %v2060_v24 = vpop.f32.mrf.mxu0 }
 0x5bd   : > { %4383 = vpow2.f32 %v1737_v7  ;;  %v2203_v46 = vpack.c.bf16 %v2172_v10, %v2171_v9  ;;  %v2061_v25 = vadd.f32 %v5211_v56, %v2060_v24  ;;  %v2177_v20 = vmax.f32 %v2069_v26, 0.0 }
 0x5be   : > { %v4100_v21 = vpop.f32.mrf.mxu0 }
 0x5bf   : > { %v2072_v28 = vadd.f32 %v4100_v21, %v5211_v56  ;;  %4129 = vmatprep.mubr.msk.bf16.mxu0 %vm775_vm0, %v2203_v46  ;;  %v2175_v22 = vmax.f32 %v2061_v25, 0.0 }
 0x5c0   : > { %v2063_v14 = vpop.f32.mrf.mxu0  ;;  %4130 = vmatmul.mubr.msk.bf16.vlgmr.msra.gmra.mxu0 %vm775_vm0, %v2204_v16 }
 0x5c1   : > { %v2064_v17 = vadd.f32 %v5211_v56, %v2063_v14  ;;  %v2178_v27 = vmax.f32 %v2072_v28, 0.0 }
 0x5c2   : > { %v4103_v31 = vpop.f32.mrf.mxu0 }
 0x5c3   : > { %v2176_v23 = vmax.f32 %v2064_v17, 0.0  ;;  %v2206_v43 = vpack.c.bf16 %v2178_v27, %v2177_v20  ;;  %v2085_v50 = vadd.f32 %v4103_v31, %v5211_v56 }
 0x5c4   : > { %v2076_v34 = vpop.f32.mrf.mxu0 }
 0x5c5   : > { %v2205_v3 = vpack.c.bf16 %v2176_v23, %v2175_v22  ;;  %v2077_v45 = vadd.f32 %v5211_v56, %v2076_v34  ;;  %v2181_v11 = vmax.f32 %v2085_v50, 0.0 }
 0x5c6   : > { %v4104_v12 = vpop.f32.mrf.mxu0  ;;  %v5228_v37 = vpop.eup %4381 }
 0x5c7   : > { %v2088_v62 = vadd.f32 %v4104_v12, %v5211_v56  ;;  %4133 = vmatprep.mubr.msk.bf16.mxu0 %vm775_vm0, %v2205_v3  ;;  %v2179_v36 = vmax.f32 %v2077_v45, 0.0 }
 0x5c8   : > { %v2079_v35 = vpop.f32.mrf.mxu0  ;;  %4134 = vmatmul.mubr.msk.bf16.gmra.mxu0 %vm775_vm0, %v2206_v43 }
 0x5c9   : > { %v2080_v40 = vadd.f32 %v5211_v56, %v2079_v35  ;;  %v2182_v44 = vmax.f32 %v2088_v62, 0.0 }
 0x5ca   : > { %v5231_v38 = vpop.eup %4383  ;;  %v4107_v59 = vpop.f32.mrf.mxu0 }
 0x5cb   : > { %v2180_v47 = vmax.f32 %v2080_v40, 0.0  ;;  %v1739_v41 = vpack.c.bf16 %v5231_v38, %v5228_v37  ;;  %v2208_v54 = vpack.c.bf16 %v2182_v44, %v2181_v11  ;;  %v2101_v42 = vadd.f32 %v4107_v59, %v5211_v56  ;;  %v3539_v37 = vld [vmem:[%s5488_s4 + $0x8] ss:$0 sm:$0xff] }
 0x5cc   : > { %v2092_v39 = vpop.f32.mrf.mxu0 }
 0x5cd   : > { %v2207_v51 = vpack.c.bf16 %v2180_v47, %v2179_v36  ;;  %v2093_v52 = vadd.f32 %v5211_v56, %v2092_v39  ;;  %v2185_v33 = vmax.f32 %v2101_v42, 0.0 }
 0x5ce   : > { %v4108_v55 = vpop.f32.mrf.mxu0 }
 0x5cf   : > { %v2104_v13 = vadd.f32 %v4108_v55, %v5211_v56  ;;  %4137 = vmatprep.mubr.msk.bf16.mxu0 %vm775_vm0, %v2207_v51  ;;  %v2183_v19 = vmax.f32 %v2093_v52, 0.0 }
 0x5d0   : > { %v2095_v2 = vpop.f32.mrf.mxu0  ;;  %4138 = vmatmul.mubr.msk.bf16.gmra.mxu0 %vm775_vm0, %v2208_v54 }
 0x5d1   : > { %v2096_v63 = vadd.f32 %v5211_v56, %v2095_v2  ;;  %v2186_v5 = vmax.f32 %v2104_v13, 0.0 }
 0x5d2   : > { %v4111_v61 = vpop.f32.mrf.mxu0 }
 0x5d3   : > { %v2184_v30 = vmax.f32 %v2096_v63, 0.0  ;;  %v2210_v53 = vpack.c.bf16 %v2186_v5, %v2185_v33  ;;  %v2117_v8 = vadd.f32 %v4111_v61, %v5211_v56 }
 0x5d4   : > { %v2108_v48 = vpop.f32.mrf.mxu0 }
 0x5d5   : > { %v2209_v32 = vpack.c.bf16 %v2184_v30, %v2183_v19  ;;  %v2109_v58 = vadd.f32 %v5211_v56, %v2108_v48  ;;  %v2189_v4 = vmax.f32 %v2117_v8, 0.0  ;;  %v4367_v19 = vld [vmem:[#allocation2 + $0x68] sm:$0xff]   ;;  %v4368_v30 = vld [vmem:[#allocation2 + $0x60] sm:$0xff]  }
 0x5d6   : > { %v4112_v57 = vpop.f32.mrf.mxu0  ;;  %4161 = vmatprep.subr.bf16.mxu0 %v4367_v19 }
 0x5d7   : > { %v2120_v60 = vadd.f32 %v4112_v57, %v5211_v56  ;;  %4141 = vmatprep.mubr.msk.bf16.mxu0 %vm775_vm0, %v2209_v32  ;;  %v2187_v29 = vmax.f32 %v2109_v58, 0.0  ;;  %4162 = vmatpush3.bf16.msra.mxu0 %v4367_v19 }
 0x5d8   : > { %v2111_v0 = vpop.f32.mrf.mxu0  ;;  %4142 = vmatmul.mubr.msk.bf16.gmra.mxu0 %vm775_vm0, %v2210_v53  ;;  %4163 = vmatprep.subr.bf16.mxu0 %v4368_v30 }
 0x5d9   : > { %v2112_v1 = vadd.f32 %v5211_v56, %v2111_v0  ;;  %v2190_v18 = vmax.f32 %v2120_v60, 0.0 }
 0x5da   : > { %v4115_v49 = vpop.f32.mrf.mxu0 }
 0x5db   : > { %v2188_v6 = vmax.f32 %v2112_v1, 0.0  ;;  %v2212_v10 = vpack.c.bf16 %v2190_v18, %v2189_v4  ;;  %v2133_v16 = vadd.f32 %v4115_v49, %v5211_v56  ;;  %4164 = vmatpush3.bf16.msra.mxu0 %v4368_v30 }
 0x5dc   : > { %v2124_v7 = vpop.f32.mrf.mxu0 }
 0x5dd   : > { %v2211_v9 = vpack.c.bf16 %v2188_v6, %v2187_v29  ;;  %v2125_v24 = vadd.f32 %v5211_v56, %v2124_v7  ;;  %v2193_v27 = vmax.f32 %v2133_v16, 0.0 }
 0x5de   : > { %v4116_v15 = vpop.f32.mrf.mxu0 }
 0x5df   : > { %v2136_v46 = vadd.f32 %v4116_v15, %v5211_v56  ;;  %4145 = vmatprep.mubr.msk.bf16.mxu0 %vm775_vm0, %v2211_v9  ;;  %v2191_v14 = vmax.f32 %v2125_v24, 0.0 }
 0x5e0   : > { %v2127_v21 = vpop.f32.mrf.mxu0  ;;  %4146 = vmatmul.mubr.msk.bf16.gmra.mxu0 %vm775_vm0, %v2212_v10 }
 0x5e1   : > { %v2128_v25 = vadd.f32 %v5211_v56, %v2127_v21  ;;  %v2194_v28 = vmax.f32 %v2136_v46, 0.0 }
 0x5e2   : > { %v4119_v26 = vpop.f32.mrf.mxu0 }
 0x5e3   : > { %v2192_v17 = vmax.f32 %v2128_v25, 0.0  ;;  %v2214_v23 = vpack.c.bf16 %v2194_v28, %v2193_v27  ;;  %v2149_v43 = vadd.f32 %v4119_v26, %v5211_v56 }
 0x5e4   : > { %v2140_v31 = vpop.f32.mrf.mxu0 }
 0x5e5   : > { %v2213_v22 = vpack.c.bf16 %v2192_v17, %v2191_v14  ;;  %v2141_v34 = vadd.f32 %v5211_v56, %v2140_v31  ;;  %v2197_v44 = vmax.f32 %v2149_v43, 0.0 }
 0x5e6   : > { %v4120_v20 = vpop.f32.mrf.mxu0 }
 0x5e7   : > { %v2152_v3 = vadd.f32 %v4120_v20, %v5211_v56  ;;  %4149 = vmatprep.mubr.msk.bf16.mxu0 %vm775_vm0, %v2213_v22  ;;  %v2195_v35 = vmax.f32 %v2141_v34, 0.0 }
 0x5e8   : > { %v2143_v12 = vpop.f32.mrf.mxu0  ;;  %4150 = vmatmul.mubr.msk.bf16.gmra.mxu0 %vm775_vm0, %v2214_v23 }
 0x5e9   : > { %v2144_v45 = vadd.f32 %v5211_v56, %v2143_v12  ;;  %v2198_v62 = vmax.f32 %v2152_v3, 0.0 }
 0x5ea   : > { %v4123_v50 = vpop.f32.mrf.mxu0 }
 0x5eb   : > { %v2196_v40 = vmax.f32 %v2144_v45, 0.0  ;;  %v2216_v47 = vpack.c.bf16 %v2198_v62, %v2197_v44  ;;  %v2165_v54 = vadd.f32 %v4123_v50, %v5211_v56 }
 0x5ec   : > { %v2156_v59 = vpop.f32.mrf.mxu0 }
 0x5ed   : > { %v2215_v36 = vpack.c.bf16 %v2196_v40, %v2195_v35  ;;  %v2157_v39 = vadd.f32 %v5211_v56, %v2156_v59  ;;  %v2201_v63 = vmax.f32 %v2165_v54, 0.0 }
 0x5ee   : > { %v4124_v11 = vpop.f32.mrf.mxu0 }
 0x5ef   : > { %v2168_v51 = vadd.f32 %v4124_v11, %v5211_v56  ;;  %4153 = vmatprep.mubr.msk.bf16.mxu0 %vm775_vm0, %v2215_v36  ;;  %v2199_v42 = vmax.f32 %v2157_v39, 0.0 }
 0x5f0   : > { %v2159_v55 = vpop.f32.mrf.mxu0  ;;  %4154 = vmatmul.mubr.msk.bf16.gmra.mxu0 %vm775_vm0, %v2216_v47 }
 0x5f1   : > { %v2160_v52 = vadd.f32 %v5211_v56, %v2159_v55  ;;  %v2202_v13 = vmax.f32 %v2168_v51, 0.0  ;;  %v5270_v56 = vld [vmem:[%s5488_s4 + $0x5] ss:$0 sm:$0xff] }
 0x5f3   : > { %v2200_v2 = vmax.f32 %v2160_v52, 0.0  ;;  %v2218_v61 = vpack.c.bf16 %v2202_v13, %v2201_v63 }
 0x5f5   : > { %v2217_v5 = vpack.c.bf16 %v2200_v2, %v2199_v42 }
 0x5f7   : > { %4157 = vmatprep.mubr.msk.bf16.mxu0 %vm775_vm0, %v2217_v5 }
 0x5f8   : > { %4158 = vmatmul.mubr.msk.bf16.gmra.mxu0 %vm775_vm0, %v2218_v61 }
 0x680   : > { %v4131_v33 = vpop.f32.mrf.mxu0 }
 0x681   : > { %v2326_v58 = vadd.f32 %v4131_v33, %v5270_v56 }
 0x682   : > { %v2317_v48 = vpop.f32.mrf.mxu0 }
 0x683   : > { %v2318_v53 = vadd.f32 %v5270_v56, %v2317_v48  ;;  %v2446_v29 = vmax.f32 %v2326_v58, 0.0 }
 0x684   : > { %v4132_v32 = vpop.f32.mrf.mxu0 }
 0x685   : > { %v2329_v57 = vadd.f32 %v4132_v32, %v5270_v56  ;;  %v2444_v18 = vmax.f32 %v2318_v53, 0.0 }
 0x686   : > { %v2320_v60 = vpop.f32.mrf.mxu0 }
 0x687   : > { %v2321_v8 = vadd.f32 %v5270_v56, %v2320_v60  ;;  %v2447_v0 = vmax.f32 %v2329_v57, 0.0 }
 0x688   : > { %v4135_v1 = vpop.f32.mrf.mxu0 }
 0x689   : > { %v2445_v49 = vmax.f32 %v2321_v8, 0.0  ;;  %v2477_v7 = vpack.c.bf16 %v2447_v0, %v2446_v29  ;;  %v2342_v24 = vadd.f32 %v4135_v1, %v5270_v56 }
 0x68a   : > { %v2333_v6 = vpop.f32.mrf.mxu0 }
 0x68b   : > { %v2476_v4 = vpack.c.bf16 %v2445_v49, %v2444_v18  ;;  %v2334_v10 = vadd.f32 %v5270_v56, %v2333_v6  ;;  %v2450_v14 = vmax.f32 %v2342_v24, 0.0 }
 0x68c   : > { %v4136_v9 = vpop.f32.mrf.mxu0 }
 0x68d   : > { %v2345_v15 = vadd.f32 %v4136_v9, %v5270_v56  ;;  %4165 = vmatprep.mubr.msk.bf16.mxu0 %vm775_vm0, %v2476_v4  ;;  %v2448_v28 = vmax.f32 %v2334_v10, 0.0 }
 0x68e   : > { %v2336_v46 = vpop.f32.mrf.mxu0  ;;  %4166 = vmatmul.mubr.msk.bf16.vlgmr.msra.gmra.mxu0 %vm775_vm0, %v2477_v7 }
 0x68f   : > { %v2337_v16 = vadd.f32 %v5270_v56, %v2336_v46  ;;  %v2451_v21 = vmax.f32 %v2345_v15, 0.0 }
 0x690   : > { %v4139_v25 = vpop.f32.mrf.mxu0 }
 0x691   : > { %v2449_v26 = vmax.f32 %v2337_v16, 0.0  ;;  %v2479_v31 = vpack.c.bf16 %v2451_v21, %v2450_v14  ;;  %v2358_v34 = vadd.f32 %v4139_v25, %v5270_v56 }
 0x692   : > { %v2349_v17 = vpop.f32.mrf.mxu0 }
 0x693   : > { %v2478_v27 = vpack.c.bf16 %v2449_v26, %v2448_v28  ;;  %v2350_v23 = vadd.f32 %v5270_v56, %v2349_v17  ;;  %v2454_v35 = vmax.f32 %v2358_v34, 0.0 }
 0x694   : > { %v4140_v22 = vpop.f32.mrf.mxu0 }
 0x695   : > { %v2361_v20 = vadd.f32 %v4140_v22, %v5270_v56  ;;  %4169 = vmatprep.mubr.msk.bf16.mxu0 %vm775_vm0, %v2478_v27  ;;  %v2452_v62 = vmax.f32 %v2350_v23, 0.0 }
 0x696   : > { %v2352_v3 = vpop.f32.mrf.mxu0  ;;  %4170 = vmatmul.mubr.msk.bf16.gmra.mxu0 %vm775_vm0, %v2479_v31 }
 0x697   : > { %v2353_v43 = vadd.f32 %v5270_v56, %v2352_v3  ;;  %v2455_v12 = vmax.f32 %v2361_v20, 0.0 }
 0x698   : > { %v4143_v45 = vpop.f32.mrf.mxu0 }
 0x699   : > { %v2453_v50 = vmax.f32 %v2353_v43, 0.0  ;;  %v2481_v59 = vpack.c.bf16 %v2455_v12, %v2454_v35  ;;  %v2374_v39 = vadd.f32 %v4143_v45, %v5270_v56 }
 0x69a   : > { %v2365_v40 = vpop.f32.mrf.mxu0 }
 0x69b   : > { %v2480_v44 = vpack.c.bf16 %v2453_v50, %v2452_v62  ;;  %v2366_v47 = vadd.f32 %v5270_v56, %v2365_v40  ;;  %v2458_v2 = vmax.f32 %v2374_v39, 0.0 }
 0x69c   : > { %v4144_v36 = vpop.f32.mrf.mxu0 }
 0x69d   : > { %v2377_v11 = vadd.f32 %v4144_v36, %v5270_v56  ;;  %4173 = vmatprep.mubr.msk.bf16.mxu0 %vm775_vm0, %v2480_v44  ;;  %v2456_v13 = vmax.f32 %v2366_v47, 0.0 }
 0x69e   : > { %v2368_v51 = vpop.f32.mrf.mxu0  ;;  %4174 = vmatmul.mubr.msk.bf16.gmra.mxu0 %vm775_vm0, %v2481_v59 }
 0x69f   : > { %v2369_v54 = vadd.f32 %v5270_v56, %v2368_v51  ;;  %v2459_v55 = vmax.f32 %v2377_v11, 0.0 }
 0x6a0   : > { %v4147_v52 = vpop.f32.mrf.mxu0 }
 0x6a1   : > { %v2457_v42 = vmax.f32 %v2369_v54, 0.0  ;;  %v2483_v61 = vpack.c.bf16 %v2459_v55, %v2458_v2  ;;  %v2390_v48 = vadd.f32 %v4147_v52, %v5270_v56 }
 0x6a2   : > { %v2381_v63 = vpop.f32.mrf.mxu0 }
 0x6a3   : > { %v2482_v5 = vpack.c.bf16 %v2457_v42, %v2456_v13  ;;  %v2382_v30 = vadd.f32 %v5270_v56, %v2381_v63  ;;  %v2462_v0 = vmax.f32 %v2390_v48, 0.0  ;;  %v5323_v42 = vld [vmem:[%s5488_s4 + $0x6] ss:$0 sm:$0xff] }
 0x6a4   : > { %v4148_v19 = vpop.f32.mrf.mxu0 }
 0x6a5   : > { %v2393_v33 = vadd.f32 %v4148_v19, %v5270_v56  ;;  %4177 = vmatprep.mubr.msk.bf16.mxu0 %vm775_vm0, %v2482_v5  ;;  %v2460_v60 = vmax.f32 %v2382_v30, 0.0 }
 0x6a6   : > { %v2384_v32 = vpop.f32.mrf.mxu0  ;;  %4178 = vmatmul.mubr.msk.bf16.gmra.mxu0 %vm775_vm0, %v2483_v61 }
 0x6a7   : > { %v2385_v53 = vadd.f32 %v5270_v56, %v2384_v32  ;;  %v2463_v57 = vmax.f32 %v2393_v33, 0.0 }
 0x6a8   : > { %v4151_v58 = vpop.f32.mrf.mxu0 }
 0x6a9   : > { %v2461_v8 = vmax.f32 %v2385_v53, 0.0  ;;  %v2485_v49 = vpack.c.bf16 %v2463_v57, %v2462_v0  ;;  %v2406_v7 = vadd.f32 %v4151_v58, %v5270_v56 }
 0x6aa   : > { %v2397_v1 = vpop.f32.mrf.mxu0 }
 0x6ab   : > { %v2484_v18 = vpack.c.bf16 %v2461_v8, %v2460_v60  ;;  %v2398_v6 = vadd.f32 %v5270_v56, %v2397_v1  ;;  %v2466_v21 = vmax.f32 %v2406_v7, 0.0 }
 0x6ac   : > { %v4152_v29 = vpop.f32.mrf.mxu0 }
 0x6ad   : > { %v2409_v4 = vadd.f32 %v4152_v29, %v5270_v56  ;;  %4181 = vmatprep.mubr.msk.bf16.mxu0 %vm775_vm0, %v2484_v18  ;;  %v2464_v46 = vmax.f32 %v2398_v6, 0.0 }
 0x6ae   : > { %v2400_v9 = vpop.f32.mrf.mxu0  ;;  %4182 = vmatmul.mubr.msk.bf16.gmra.mxu0 %vm775_vm0, %v2485_v49 }
 0x6af   : > { %v2401_v10 = vadd.f32 %v5270_v56, %v2400_v9  ;;  %v2467_v15 = vmax.f32 %v2409_v4, 0.0 }
 0x6b0   : > { %v4155_v24 = vpop.f32.mrf.mxu0 }
 0x6b1   : > { %v2465_v16 = vmax.f32 %v2401_v10, 0.0  ;;  %v2487_v26 = vpack.c.bf16 %v2467_v15, %v2466_v21  ;;  %v2422_v31 = vadd.f32 %v4155_v24, %v5270_v56 }
 0x6b2   : > { %v2413_v25 = vpop.f32.mrf.mxu0 }
 0x6b3   : > { %v2486_v28 = vpack.c.bf16 %v2465_v16, %v2464_v46  ;;  %v2414_v17 = vadd.f32 %v5270_v56, %v2413_v25  ;;  %v2470_v12 = vmax.f32 %v2422_v31, 0.0 }
 0x6b4   : > { %v4156_v14 = vpop.f32.mrf.mxu0 }
 0x6b5   : > { %v2425_v27 = vadd.f32 %v4156_v14, %v5270_v56  ;;  %4185 = vmatprep.mubr.msk.bf16.mxu0 %vm775_vm0, %v2486_v28  ;;  %v2468_v3 = vmax.f32 %v2414_v17, 0.0 }
 0x6b6   : > { %v2416_v22 = vpop.f32.mrf.mxu0  ;;  %4186 = vmatmul.mubr.msk.bf16.gmra.mxu0 %vm775_vm0, %v2487_v26 }
 0x6b7   : > { %v2417_v23 = vadd.f32 %v5270_v56, %v2416_v22  ;;  %v2471_v20 = vmax.f32 %v2425_v27, 0.0 }
 0x6b8   : > { %v4159_v34 = vpop.f32.mrf.mxu0 }
 0x6b9   : > { %v2469_v43 = vmax.f32 %v2417_v23, 0.0  ;;  %v2489_v50 = vpack.c.bf16 %v2471_v20, %v2470_v12  ;;  %v2438_v59 = vadd.f32 %v4159_v34, %v5270_v56 }
 0x6ba   : > { %v2429_v45 = vpop.f32.mrf.mxu0 }
 0x6bb   : > { %v2488_v62 = vpack.c.bf16 %v2469_v43, %v2468_v3  ;;  %v2430_v40 = vadd.f32 %v5270_v56, %v2429_v45  ;;  %v2474_v54 = vmax.f32 %v2438_v59, 0.0 }
 0x6bc   : > { %v4160_v35 = vpop.f32.mrf.mxu0 }
 0x6bd   : > { %v2441_v44 = vadd.f32 %v4160_v35, %v5270_v56  ;;  %4189 = vmatprep.mubr.msk.bf16.mxu0 %vm775_vm0, %v2488_v62  ;;  %v2472_v39 = vmax.f32 %v2430_v40, 0.0 }
 0x6be   : > { %v2432_v36 = vpop.f32.mrf.mxu0  ;;  %4190 = vmatmul.mubr.msk.bf16.gmra.mxu0 %vm775_vm0, %v2489_v50 }
 0x6bf   : > { %v2433_v47 = vadd.f32 %v5270_v56, %v2432_v36  ;;  %v2475_v11 = vmax.f32 %v2441_v44, 0.0 }
 0x6c1   : > { %v2473_v51 = vmax.f32 %v2433_v47, 0.0  ;;  %v2491_v52 = vpack.c.bf16 %v2475_v11, %v2474_v54 }
 0x6c3   : > { %v2490_v55 = vpack.c.bf16 %v2473_v51, %v2472_v39 }
 0x6c5   : > { %4193 = vmatprep.mubr.msk.bf16.mxu0 %vm775_vm0, %v2490_v55 }
 0x6c6   : > { %4194 = vmatmul.mubr.msk.bf16.gmra.mxu0 %vm775_vm0, %v2491_v52 }
 0x74e   : > { %v4167_v13 = vpop.f32.mrf.mxu0 }
 0x74f   : > { %v2599_v63 = vadd.f32 %v4167_v13, %v5323_v42 }
 0x750   : > { %v2590_v2 = vpop.f32.mrf.mxu0 }
 0x751   : > { %v2591_v5 = vadd.f32 %v5323_v42, %v2590_v2  ;;  %v2719_v30 = vmax.f32 %v2599_v63, 0.0 }
 0x752   : > { %v4168_v56 = vpop.f32.mrf.mxu0 }
 0x753   : > { %v2602_v61 = vadd.f32 %v4168_v56, %v5323_v42  ;;  %v2717_v53 = vmax.f32 %v2591_v5, 0.0 }
 0x754   : > { %v2593_v19 = vpop.f32.mrf.mxu0 }
 0x755   : > { %v2720_v33 = vmax.f32 %v2602_v61, 0.0  ;;  %v2594_v48 = vadd.f32 %v5323_v42, %v2593_v19 }
 0x756   : > { %v4171_v32 = vpop.f32.mrf.mxu0 }
 0x757   : > { %v5329_v57 = vpack.c.bf16 %v2720_v33, %v2719_v30  ;;  %v2718_v58 = vmax.f32 %v2594_v48, 0.0  ;;  %v2615_v0 = vadd.f32 %v4171_v32, %v5323_v42 }
 0x758   : > { %v2606_v60 = vpop.f32.mrf.mxu0 }
 0x759   : > { %v5331_v8 = vpack.c.bf16 %v2718_v58, %v2717_v53  ;;  %v2607_v18 = vadd.f32 %v5323_v42, %v2606_v60  ;;  %v2723_v6 = vmax.f32 %v2615_v0, 0.0 }
 0x75a   : > { %v4172_v1 = vpop.f32.mrf.mxu0 }
 0x75b   : > { %v2618_v49 = vadd.f32 %v4172_v1, %v5323_v42  ;;  %v2721_v10 = vmax.f32 %v2607_v18, 0.0 }
 0x75c   : > { %v2609_v29 = vpop.f32.mrf.mxu0 }
 0x75d   : > { %v2724_v4 = vmax.f32 %v2618_v49, 0.0  ;;  %v2610_v7 = vadd.f32 %v5323_v42, %v2609_v29 }
 0x75e   : > { %v4175_v9 = vpop.f32.mrf.mxu0 }
 0x75f   : > { %v5337_v15 = vpack.c.bf16 %v2724_v4, %v2723_v6  ;;  %v2722_v24 = vmax.f32 %v2610_v7, 0.0  ;;  %v2631_v1 = vadd.f32 %v4175_v9, %v5323_v42 }
 0x760   : > { %v2622_v46 = vpop.f32.mrf.mxu0 }
 0x761   : > { %v5339_v16 = vpack.c.bf16 %v2722_v24, %v2721_v10 }
 0x762   : > { %v4176_v21 = vpop.f32.mrf.mxu0 }
 0x763   : > { %v2634_v48 = vadd.f32 %v4176_v21, %v5323_v42 }
 0x764   : > { %v2625_v25 = vpop.f32.mrf.mxu0 }
 0x765   : > { %v2728_v6 = vmax.f32 %v2634_v48, 0.0  ;;  %v2626_v4 = vadd.f32 %v5323_v42, %v2625_v25 }
 0x766   : > { %v4179_v28 = vpop.f32.mrf.mxu0 }
 0x767   : > { %v2647_v36 = vadd.f32 %v4179_v28, %v5323_v42  ;;  %v2727_v28 = vmax.f32 %v2631_v1, 0.0 }
 0x768   : > { %v2638_v26 = vpop.f32.mrf.mxu0 }
 0x769   : > { %v2731_v56 = vmax.f32 %v2647_v36, 0.0  ;;  %v2639_v5 = vadd.f32 %v5323_v42, %v2638_v26  ;;  %v2623_v26 = vadd.f32 %v5323_v42, %v2622_v46 }
 0x76a   : > { %v4180_v14 = vpop.f32.mrf.mxu0 }
 0x76b   : > { %v2650_v40 = vadd.f32 %v4180_v14, %v5323_v42  ;;  %v2729_v18 = vmax.f32 %v2639_v5, 0.0  ;;  %v2725_v25 = vmax.f32 %v2623_v26, 0.0 }
 0x76c   : > { %v2641_v17 = vpop.f32.mrf.mxu0 }
 0x76d   : > { %v2732_v51 = vmax.f32 %v2650_v40, 0.0  ;;  %v2642_v54 = vadd.f32 %v5323_v42, %v2641_v17  ;;  %v2754_v17 = vpack.c.bf16 %v2728_v6, %v2727_v28 }
 0x76e   : > { %v5341_v27 = vpop.f32.mrf.mxu0 }
 0x76f   : > { %v2756_v32 = vpack.c.bf16 %v2732_v51, %v2731_v56  ;;  %v2730_v53 = vmax.f32 %v2642_v54, 0.0 }
 0x770   : > { %v5343_v31 = vpop.f32.mrf.mxu0 }
 0x771   : > { %v2755_v7 = vpack.c.bf16 %v2730_v53, %v2729_v18  ;;  %v4504_v53 = vmov 0.0  }
 0x772   : > { %v5345_v22 = vpop.f32.mrf.mxu0  ;;  %4229 = vmatprep.subr.bf16.mxu0 %v4504_v53  ;;  %4233 = vmatprep.mubr.msk.bf16.mxu0 %vm4505_vm1, %v4504_v53 }
 0x773   : > { %v2666_v46 = vadd.f32 %v5345_v22, %v5323_v42  ;;  %v2655_v22 = vadd.f32 %v5323_v42, %v5343_v31  ;;  %v4370_v31 = vld [vmem:[#allocation2 + $0x70] sm:$0xff]  }
 0x774   : > { %v5347_v23 = vpop.f32.mrf.mxu0 }
 0x776   : > { %v4187_v20 = vpop.f32.mrf.mxu0 }
 0x777   : > { %v2679_v9 = vadd.f32 %v4187_v20, %v5323_v42 }
 0x778   : > { %v2670_v34 = vpop.f32.mrf.mxu0 }
 0x77a   : > { %v4188_v3 = vpop.f32.mrf.mxu0 }
 0x77b   : > { %v2682_v10 = vadd.f32 %v4188_v3, %v5323_v42  ;;  %v2671_v3 = vadd.f32 %v5323_v42, %v2670_v34 }
 0x77c   : > { %v2673_v43 = vpop.f32.mrf.mxu0 }
 0x77d   : > { %v2737_v36 = vmax.f32 %v2671_v3, 0.0  ;;  %v4373_v3 = vld [vmem:[#allocation2 + $0x88] sm:$0xff]  }
 0x77e   : > { %v4191_v12 = vpop.f32.mrf.mxu0 }
 0x77f   : > { %v2695_v61 = vadd.f32 %v4191_v12, %v5323_v42  ;;  %v2726_v12 = vmax.f32 %v2626_v4, 0.0 }
 0x780   : > { %v2686_v45 = vpop.f32.mrf.mxu0 }
 0x781   : > { %v2743_v49 = vmax.f32 %v2695_v61, 0.0  ;;  %v2687_v29 = vadd.f32 %v5323_v42, %v2686_v45  ;;  %v2740_v45 = vmax.f32 %v2682_v10, 0.0  ;;  %v2753_v40 = vpack.c.bf16 %v2726_v12, %v2725_v25 }
 0x782   : > { %v4192_v62 = vpop.f32.mrf.mxu0 }
 0x783   : > { %v2698_v52 = vadd.f32 %v4192_v62, %v5323_v42  ;;  %v2741_v14 = vmax.f32 %v2687_v29, 0.0  ;;  %v2674_v62 = vadd.f32 %v5323_v42, %v2673_v43  ;;  %v2736_v43 = vmax.f32 %v2666_v46, 0.0  ;;  %v4374_v46 = vld [vmem:[#allocation2 + $0x80] sm:$0xff]  }
 0x784   : > { %v2689_v50 = vpop.f32.mrf.mxu0 }
 0x785   : > { %v2744_v58 = vmax.f32 %v2698_v52, 0.0  ;;  %v2690_v60 = vadd.f32 %v5323_v42, %v2689_v50  ;;  %v2738_v20 = vmax.f32 %v2674_v62, 0.0 }
 0x786   : > { %v4195_v35 = vpop.f32.mrf.mxu0 }
 0x787   : > { %v2711_v59 = vadd.f32 %v4195_v35, %v5323_v42  ;;  %v2762_v24 = vpack.c.bf16 %v2744_v58, %v2743_v49  ;;  %v2742_v21 = vmax.f32 %v2690_v60, 0.0  ;;  %v2739_v35 = vmax.f32 %v2679_v9, 0.0  ;;  %v4372_v58 = vld [vmem:[#allocation2 + $0x90] sm:$0xff]   ;;  %v3528_v60 = vld [vmem:[%s5488_s4 + $0x7] ss:$0 sm:$0xff] }
 0x788   : > { %v2702_v44 = vpop.f32.mrf.mxu0 }
 0x789   : > { %v2703_v11 = vadd.f32 %v5323_v42, %v2702_v44  ;;  %v2747_v13 = vmax.f32 %v2711_v59, 0.0  ;;  %v2761_v50 = vpack.c.bf16 %v2742_v21, %v2741_v14  ;;  %v2760_v44 = vpack.c.bf16 %v2740_v45, %v2739_v35 }
 0x78a   : > { %v4196_v47 = vpop.f32.mrf.mxu0  ;;  %v2663_v59 = vadd.f32 %v5341_v27, %v5323_v42  ;;  %v2733_v27 = vmax.f32 %v2655_v22, 0.0 }
 0x78b   : > { %v2714_v39 = vadd.f32 %v4196_v47, %v5323_v42  ;;  %v2745_v19 = vmax.f32 %v2703_v11, 0.0  ;;  %v2658_v47 = vadd.f32 %v5323_v42, %v5347_v23  ;;  %v2759_v11 = vpack.c.bf16 %v2738_v20, %v2737_v36  ;;  %v4406_v23 = vld [vmem:[%s4970_s20] ss:$8 sps:$4 sm:$0xff]  }
 0x78c   : > { %v2705_v55 = vpop.f32.mrf.mxu0  ;;  %v2735_v34 = vmax.f32 %v2663_v59, 0.0  ;;  %v4376_v20 = vld [vmem:[#allocation2 + $0xa0] sm:$0xff]  }
 0x78d   : > { %v2748_v2 = vmax.f32 %v2714_v39, 0.0  ;;  %v2706_v63 = vadd.f32 %v5323_v42, %v2705_v55  ;;  %v2734_v51 = vmax.f32 %v2658_v47, 0.0  ;;  %v4408_v55 = vld [vmem:[%s4970_s20 + $0x10] ss:$8 sps:$4 sm:$0xff]  }
 0x78e   : > { %v2758_v39 = vpack.c.bf16 %v2736_v43, %v2735_v34  ;;  %v4369_v42 = vld [vmem:[#allocation2 + $0x78] sm:$0xff]  }
 0x78f   : > { %v2764_v30 = vpack.c.bf16 %v2748_v2, %v2747_v13  ;;  %v2746_v33 = vmax.f32 %v2706_v63, 0.0  ;;  %v2757_v54 = vpack.c.bf16 %v2734_v51, %v2733_v27 }
 0x791   : > { %v2763_v0 = vpack.c.bf16 %v2746_v33, %v2745_v19  ;;  %3926 = vmatprep.subr.bf16.mxu1 %v2764_v30 }
 0x792   : > { %3927 = vmatpush3.bf16.msra.mxu1 %v2756_v32  ;;  %v4371_v32 = vld [vmem:[#allocation2 + $0x98] sm:$0xff]  }
 0x793   : > { %3928 = vmatprep.subr.bf16.mxu1 %v2763_v0 }
 0x796   : > { %3929 = vmatpush3.bf16.msra.mxu1 %v2755_v7 }
 0x797   : > { %3930 = vmatprep.subr.bf16.mxu1 %v2762_v24 }
 0x79a   : > { %3931 = vmatpush3.bf16.msra.mxu1 %v2754_v17 }
 0x79b   : > { %3932 = vmatprep.subr.bf16.mxu1 %v2761_v50 }
 0x79e   : > { %3933 = vmatpush3.bf16.msra.mxu1 %v2753_v40 }
 0x79f   : > { %3934 = vmatprep.subr.bf16.mxu1 %v2760_v44  ;;  %v4375_v44 = vld [vmem:[#allocation2 + $0xa8] sm:$0xff]  }
 0x7a2   : > { %3935 = vmatpush3.bf16.msra.mxu1 %v5337_v15  ;;  %v4407_v15 = vld [vmem:[%s4970_s20 + $0x14] ss:$8 sps:$4 sm:$0xff]   ;;  %s5440_s20 = scalar_lea.hbm %s5490_s6, %s3561_s15 }
 0x7a3   : > { %3936 = vmatprep.subr.bf16.mxu1 %v2759_v11 }
 0x7a6   : > { %3937 = vmatpush3.bf16.msra.mxu1 %v5339_v16 }
 0x7a7   : > { %3938 = vmatprep.subr.bf16.mxu1 %v2758_v39 }
 0x7aa   : > { %3939 = vmatpush3.bf16.msra.mxu1 %v5329_v57 }
 0x7ab   : > { %3940 = vmatprep.subr.bf16.mxu1 %v2757_v54 }
 0x7ae   : > { %3941 = vmatpush3.bf16.msra.mxu1 %v5331_v8 }
 0x7af   : > { %4197 = vmatprep.subr.bf16.mxu1 %v4369_v42 }
 0x7b1   : > { %2798 = vmatmul.mubr.bf16.vlgmr.msra.gmra.mxu1 %v4406_v23 }
 0x7b2   : > { %2805 = vmatprep.mubr.bf16.mxu1 %v4407_v15  ;;  %4198 = vmatpush3.bf16.msra.mxu1 %v4369_v42  ;;  %v4378_v42 = vld [vmem:[#allocation2 + $0xb0] sm:$0xff]  }
 0x7b3   : > { %4199 = vmatprep.subr.bf16.mxu1 %v4370_v31 }
 0x7b6   : > { %4200 = vmatpush3.bf16.msra.mxu1 %v4370_v31  ;;  %v3540_v31 = vld [vmem:[%s5488_s4 + $0x9] ss:$0 sm:$0xff] }
 0x7b7   : > { %4205 = vmatprep.subr.bf16.mxu1 %v4504_v53 }
 0x7b9   : > { %2806 = vmatmul.mubr.bf16.gmra.mxu1 %v4408_v55  ;;  %v4377_v55 = vld [vmem:[#allocation2 + $0xb8] sm:$0xff]  }
 0x7ba   : > { %4230 = vmatpush3.bf16.msra.mxu0 %v4377_v55 }
 0x7bb   : > { %4231 = vmatprep.subr.bf16.mxu0 %v4504_v53 }
 0x7be   : > { %4232 = vmatpush3.bf16.msra.mxu0 %v4378_v42 }
 0x871   : > { %v3942_v16 = vpop.f32.mrf.mxu1 }
 0x873   : > { %v3943_v52 = vpop.f32.mrf.mxu1 }
 0x874   : > { %v3944_v57 = vadd.f32 %v3943_v52, %v3942_v16 }
 0x875   : > { %v3945_v13 = vpop.f32.mrf.mxu1 }
 0x877   : > { %v3946_v2 = vpop.f32.mrf.mxu1 }
 0x878   : > { %v3947_v63 = vadd.f32 %v3946_v2, %v3945_v13 }
 0x879   : > { %v3948_v56 = vpop.f32.mrf.mxu1 }
 0x87a   : > { %v2814_v8 = vpack.c.bf16 %v3947_v63, %v3944_v57 }
 0x87b   : > { %v3949_v5 = vpop.f32.mrf.mxu1 }
 0x87c   : > { %4201 = vmatprep.mubr.msk.bf16.mxu1 %vm775_vm0, %v2814_v8  ;;  %v3950_v30 = vadd.f32 %v3949_v5, %v3948_v56 }
 0x87d   : > { %v3951_v61 = vpop.f32.mrf.mxu1 }
 0x87f   : > { %v3952_v19 = vpop.f32.mrf.mxu1 }
 0x880   : > { %v3953_v33 = vadd.f32 %v3952_v19, %v3951_v61  ;;  %v4379_v61 = vld [vmem:[%s5489_s5 + $0x8] sm:$0xff]   ;;  %v4380_v19 = vld [vmem:[%s5489_s5] sm:$0xff]  }
 0x882   : > { %v2815_v48 = vpack.c.bf16 %v3953_v33, %v3950_v30  ;;  %v3544_v30 = vld [vmem:[%s5488_s4 + $0xa] ss:$0 sm:$0xff] }
 0x884   : > { %4202 = vmatmul.mubr.msk.bf16.vlgmr.msra.gmra.mxu1 %vm775_vm0, %v2815_v48 }
 0x885   : > { %4209 = vmatprep.mubr.msk.bf16.mxu1 %vm4505_vm1, %v4504_v53  ;;  %4206 = vmatpush3.bf16.msra.mxu1 %v4371_v32 }
 0x886   : > { %4207 = vmatprep.subr.bf16.mxu1 %v4504_v53 }
 0x889   : > { %4208 = vmatpush3.bf16.msra.mxu1 %v4372_v58 }
 0x88a   : > { %4213 = vmatprep.subr.bf16.mxu1 %v4504_v53 }
 0x944   : > { %v4203_v0 = vpop.f32.mrf.mxu1 }
 0x945   : > { %v2881_v1 = vadd.f32 %v4203_v0, %v3528_v60 }
 0x946   : > { %v2872_v18 = vpop.f32.mrf.mxu1 }
 0x947   : > { %v2873_v49 = vadd.f32 %v3528_v60, %v2872_v18  ;;  %v2889_v6 = vmax.f32 %v2881_v1, 0.0 }
 0x948   : > { %v4204_v29 = vpop.f32.mrf.mxu1 }
 0x949   : > { %v2887_v4 = vmax.f32 %v2873_v49, 0.0  ;;  %v2884_v7 = vadd.f32 %v4204_v29, %v3528_v60 }
 0x94a   : > { %v2875_v10 = vpop.f32.mrf.mxu1 }
 0x94b   : > { %v2891_v24 = vsub.f32 %v2887_v4, %v2889_v6  ;;  %v2876_v21 = vadd.f32 %v3528_v60, %v2875_v10  ;;  %v2890_v26 = vmax.f32 %v2884_v7, 0.0 }
 0x94d   : > { %v2893_v28 = vmul.f32 %v2891_v24, %v2891_v24  ;;  %v2888_v9 = vmax.f32 %v2876_v21, 0.0 }
 0x94f   : > { %v2895_v14 = vsub.f32 0.0, %v2893_v28  ;;  %v2892_v17 = vsub.f32 %v2888_v9, %v2890_v26 }
 0x951   : > { %v2894_v12 = vmul.f32 %v2892_v17, %v2892_v17  ;;  %v2897_v45 = vmul.f32 1.442695, %v2895_v14 }
 0x953   : > { %v2896_v62 = vsub.f32 0.0, %v2894_v12  ;;  %4385 = vpow2.f32 %v2897_v45 }
 0x955   : > { %v2899_v50 = vmul.f32 1.442695, %v2896_v62 }
 0x957   : > { %4387 = vpow2.f32 %v2899_v50 }
 0x960   : > { %v4386_v25 = vpop.eup %4385 }
 0x964   : > { %v4388_v35 = vpop.eup %4387 }
 0x965   : > { %v2901_v40 = vpack.c.bf16 %v4388_v35, %v4386_v25 }
 0x967   : > { %4210 = vmatmul.mubr.msk.bf16.vlgmr.msra.gmra.mxu1 %vm775_vm0, %v2901_v40 }
 0x968   : > { %4214 = vmatpush3.bf16.msra.mxu1 %v4373_v3  ;;  %4217 = vmatprep.mubr.msk.bf16.mxu1 %vm4505_vm1, %v4504_v53 }
 0x969   : > { %4215 = vmatprep.subr.bf16.mxu1 %v4504_v53 }
 0x96c   : > { %4216 = vmatpush3.bf16.msra.mxu1 %v4374_v46 }
 0x96d   : > { %4221 = vmatprep.subr.bf16.mxu1 %v4504_v53 }
 0x96f   : > { %4218 = vmatmul.mubr.msk.bf16.vlgmr.msra.gmra.mxu1 %vm775_vm0, %v1739_v41 }
 0x970   : > { %4225 = vmatprep.mubr.msk.bf16.mxu1 %vm4505_vm1, %v4504_v53  ;;  %4222 = vmatpush3.bf16.msra.mxu1 %v4375_v44 }
 0x971   : > { %4223 = vmatprep.subr.bf16.mxu1 %v4504_v53 }
 0x974   : > { %4224 = vmatpush3.bf16.msra.mxu1 %v4376_v20 }
 0x975   : > { %4237 = vmatprep.subr.bf16.mxu1 %v4504_v53 }
 0xa27   : > { %v2956_v59 = vpop.f32.mrf.mxu1 }
 0xa29   : > { %v4211_v36 = vpop.f32.mrf.mxu1 }
 0xa2b   : > { %v2959_v43 = vpop.f32.mrf.mxu1 }
 0xa2d   : > { %v4212_v47 = vpop.f32.mrf.mxu1 }
 0xa2f   : > { %v3012_v11 = vpop.f32.mrf.mxu1 }
 0xa30   : > { %v3013_v34 = vadd.f32 %v3012_v11, %v2956_v59 }
 0xa31   : > { %v4219_v38 = vpop.f32.mrf.mxu1 }
 0xa32   : > { %v3024_v22 = vadd.f32 %v3539_v37, %v3013_v34 }
 0xa33   : > { %v3015_v41 = vpop.f32.mrf.mxu1 }
 0xa34   : > { %v3016_v39 = vadd.f32 %v3015_v41, %v2959_v43  ;;  %v3026_v54 = vmax.f32 %v3024_v22, 0.0 }
 0xa35   : > { %v4220_v51 = vpop.f32.mrf.mxu1 }
 0xa36   : > { %v3025_v27 = vadd.f32 %v3539_v37, %v3016_v39 }
 0xa38   : > { %v3027_v23 = vmax.f32 %v3025_v27, 0.0 }
 0xa3a   : > { %v3028_v15 = vpack.c.bf16 %v3027_v23, %v3026_v54 }
 0xa3c   : > { %4226 = vmatmul.mubr.msk.bf16.vlgmr.msra.gmra.mxu1 %vm775_vm0, %v3028_v15 }
 0xa3d   : > { %4241 = vmatprep.mubr.msk.bf16.mxu1 %vm4505_vm1, %v4504_v53  ;;  %4238 = vmatpush3.bf16.msra.mxu1 %v4379_v61 }
 0xa3e   : > { %4239 = vmatprep.subr.bf16.mxu1 %v4504_v53  ;;  %v3548_v53 = vld [vmem:[%s5488_s4 + $0xb] ss:$0 sm:$0xff] }
 0xa41   : > { %4240 = vmatpush3.bf16.msra.mxu1 %v4380_v19 }
 0xafc   : > { %v3088_v16 = vpop.f32.mrf.mxu1 }
 0xafd   : > { %v3089_v52 = vadd.f32 %v3540_v31, %v3088_v16 }
 0xafe   : > { %v4227_v13 = vpop.f32.mrf.mxu1 }
 0xaff   : > { %4389 = vtanh.f32 %v3089_v52 }
 0xb00   : > { %v3091_v2 = vpop.f32.mrf.mxu1 }
 0xb01   : > { %v3092_v57 = vadd.f32 %v3540_v31, %v3091_v2 }
 0xb02   : > { %v4228_v63 = vpop.f32.mrf.mxu1 }
 0xb03   : > { %4391 = vtanh.f32 %v3092_v57 }
 0xb0c   : > { %v4390_v56 = vpop.eup %4389 }
 0xb10   : > { %v4392_v8 = vpop.eup %4391 }
 0xb11   : > { %v3097_v5 = vpack.c.bf16 %v4392_v8, %v4390_v56 }
 0xb13   : > { %4234 = vmatmul.mubr.msk.bf16.vlgmr.msra.gmra.mxu0 %vm775_vm0, %v3097_v5 }
 0xbd3   : > { %v3157_v33 = vpop.f32.mrf.mxu0 }
 0xbd4   : > { %v3158_v32 = vadd.f32 %v3544_v30, %v3157_v33 }
 0xbd5   : > { %v4235_v48 = vpop.f32.mrf.mxu0 }
 0xbd6   : > { %v3164_v1 = vmax.f32 %v3158_v32, 0.0 }
 0xbd7   : > { %v3160_v58 = vpop.f32.mrf.mxu0 }
 0xbd8   : > { %v3161_v60 = vadd.f32 %v3544_v30, %v3160_v58 }
 0xbd9   : > { %v4236_v0 = vpop.f32.mrf.mxu0 }
 0xbda   : > { %v3165_v18 = vmax.f32 %v3161_v60, 0.0 }
 0xbdc   : > { %v3166_v49 = vpack.c.bf16 %v3165_v18, %v3164_v1 }
 0xbde   : > { %4242 = vmatmul.mubr.msk.bf16.vlgmr.msra.gmra.mxu1 %vm775_vm0, %v3166_v49 }
 0xc9e   : > { %v3225_v29 = vpop.f32.mrf.mxu1 }
 0xc9f   : > { %v3226_v6 = vadd.f32 %v3548_v53, %v3225_v29 }
 0xca0   : > { %v4243_v4 = vpop.f32.mrf.mxu1 }
 0xca1   : > { %v3552_v7 = vmul.f32 -1.442695, %v3226_v6 }
 0xca2   : > { %v3228_v10 = vpop.f32.mrf.mxu1 }
 0xca3   : > { %4393 = vpow2.f32 %v3552_v7  ;;  %v3229_v24 = vadd.f32 %v3548_v53, %v3228_v10 }
 0xca4   : > { %v4244_v21 = vpop.f32.mrf.mxu1 }
 0xca5   : > { %v3553_v28 = vmul.f32 -1.442695, %v3229_v24 }
 0xca7   : > { %4395 = vpow2.f32 %v3553_v28 }
 0xcb0   : > { %v4394_v26 = vpop.eup %4393 }
 0xcb1   : > { %v3238_v9 = vadd.f32 1.0, %v4394_v26 }
 0xcb3   : > { %4397 = vrcp.f32 %v3238_v9 }
 0xcb4   : > { %v4396_v14 = vpop.eup %4395 }
 0xcb5   : > { %v3239_v17 = vadd.f32 1.0, %v4396_v14 }
 0xcb7   : > { %4399 = vrcp.f32 %v3239_v17 }
 0xcc0   : > { %v4398_v12 = vpop.eup %4397 }
 0xcc1   : > { %3244 = vst [vmem:[%s296_s16] sm:$0xff] %v4398_v12 }
 0xcc4   : > { %v4400_v45 = vpop.eup %4399 }
 0xcc5   : > { %3245 = vst [vmem:[%s296_s16 + $0x8] sm:$0xff] %v4400_v45 }
 0xcc6   : > { %4448 = shalt.err (!%p4445_p1)
}
 0xcc7   : > { %s4449_s10 = scalar_lea.hbm %s5440_s20, 256  ;;  %s4453_s13 = scalar_lea.hbm %s5490_s6, 512 }
 0xcc8   : > { %p4450_p2 = scmp.ne.s32.totalorder %s5440_s20, %s4449_s10  ;;  %p4454_p7 = scmp.lt.s32.totalorder %s5440_s20, %s5490_s6 }
 0xcc9   : > { %p4455_p8 = scmp.lt.s32.totalorder %s4453_s13, %s4449_s10 }
 0xcca   : > { %p4451_p3 = pnand %p4450_p2, %p4582_p5 }
 0xccb   : > { %p4456_p6 = por %p4455_p8, %p4454_p7 }
 0xccc   : > { %p4452_p4 = pneg %p4451_p3 }
 0xcce   : > { %p4457_p9 = pnand %p4456_p6, %p4452_p4 }
 0xcd0   : > { %4460 = shalt.err (!%p4457_p9)
}
 0xcd1   : > { %s4507_s16 = smov 128   ;;  %s4508_s18 = smov 8  }
 0xcd2   : > { %4249 = dma.vmem_to_hbm [thread:$0]  (%p4582_p5), %s5442_s17, 256, %s5440_s20, %s5444_s26, %s4507_s16, %s4507_s16, %s4508_s18  }
 0xcd3 PF: > { %p4261_p10 = scmp.ge.s32.totalorder %s4499_s24, 2  ;;  %s3275_s19 = sand.u32 1, %s4487_s21  }
 0xcd4   : > { %p5494_p11 = scmp.ne.s32.totalorder %s5492_s8, 0  ;;  %s3276_s28 = scalar_lea.sflag [#allocation4], %s3275_s19 }
 0xcd6   : > { %p4256_p12 = pnand %p4261_p10, %p5494_p11 }
 0xcd8   : > { %p4257_p13 = pneg %p4256_p12 }
 0xcda   : > { %4482 = dma.done.wait (%p4257_p13), %s3276_s28, 256  }
 0xcdb   : > { %4484 = vsyncadd (%p4257_p13), %s3276_s28, 4294967040  ;;  %p17_p0 = scmp.ge.s32.totalorder %s4569_s27, 4   ;;  %s5495_s21 = smov %s4491_s22 }
 0xcdc   : > { %s5496_s22 = smov %s4495_s23  ;;  %s5497_s23 = smov %s4580_s30 }
 0xcdd   : > { %s5498_s24 = smov %s4569_s27  ;;  %19 = sbr.rel (!%p17_p0) target bundleno = 4 (0x4), region = 101 }
 0xce2   :  { %3281 = vsyncpa [#allocation3], 1 }
 0xce3   :  { %3283 = vsyncpa [#allocation3 + $0x1], 1 }
 0xce4   :  { %3284 = vsyncpa [#allocation4], 1 }
 0xce5   :  { %3286 = vsyncpa [#allocation4 + $0x1], 1 }

</bundles_post_ra>
